<compile_context>
chip_gen: v6e
topology: v6e:2x2x1
jax: 0.10.0
libtpu: 0.0.40
codegen_flags: <defaults>
</compile_context>

<pallas_src>
import jax
import jax.numpy as jnp
from jax import lax
from jax.experimental import pallas as pl
from jax.experimental.pallas import tpu as pltpu

HP = 128   # per-gate lane padding (one vreg lane-tile per gate)
OP = 128   # output-lane padding (lane-dense epilogue store)


def _char_rnn_lstm_seq_kernel(tok_ref, table_ref, bg_ref, whh_ref, who_ref, bho_ref,
                              h0_ref, c0_ref, out_ref, h1_ref, c1_ref, hs_ref):
    TB, _ = tok_ref.shape           # T*B rows
    V = table_ref.shape[0]
    Hp = whh_ref.shape[0]
    B = h0_ref.shape[0]
    T = TB // B

    table = table_ref[...]          # (V, 4*Hp)  bf16  (= embed @ W_ih^T, gate-lane padded)
    bias = bg_ref[...]              # (1, 4*Hp)  f32   (= b_ih + b_hh, gate-lane padded)
    whh = whh_ref[...]              # (Hp, 4*Hp) bf16

    # ---- Non-recurrent input path, hoisted out of the recurrence:
    # one one-hot build + ONE (T*B,V)@(V,4*Hp) matmul + one f32 bias add.
    tok = tok_ref[...]                                               # (T*B, 1) int32
    lane_iota = lax.broadcasted_iota(jnp.int32, (TB, V), 1)
    onehot = (lane_iota == tok).astype(jnp.bfloat16)                 # (T*B, V)
    gx = jnp.dot(onehot, table, preferred_element_type=jnp.float32) + bias   # (T*B, 4*Hp) f32

    h = h0_ref[...].astype(jnp.bfloat16)                             # (B, Hp) bf16 carry
    c = c0_ref[...]                                                  # (B, Hp) f32  carry
    h_f32 = h0_ref[...]

    # T is a trace-time constant; the short recurrence is fully unrolled so the
    # scheduler sees every step.  Per step: one MXU push + f32 VPU/EUP gate math.
    for t in range(T):
        gh = jnp.dot(h, whh, preferred_element_type=jnp.float32)    # (B, 4*Hp) f32
        gates = gx[t * B:(t + 1) * B, :] + gh                        # bias already in gx
        i_g = jax.nn.sigmoid(gates[:, 0 * Hp:1 * Hp])                # lane-aligned slices
        f_g = jax.nn.sigmoid(gates[:, 1 * Hp:2 * Hp])
        g_g = jnp.tanh(gates[:, 2 * Hp:3 * Hp])
        o_g = jax.nn.sigmoid(gates[:, 3 * Hp:4 * Hp])
        c = f_g * c + i_g * g_g
        h_f32 = o_g * jnp.tanh(c)
        hs_ref[pl.ds(t * B, B), :] = h_f32                           # off the carry chain
        h = h_f32.astype(jnp.bfloat16)

    # ---- Deferred batched epilogue: one matmul, one softmax, one dense store.
    hs = hs_ref[...].astype(jnp.bfloat16)                            # (T*B, Hp)
    logits = jnp.dot(hs, who_ref[...],
                     preferred_element_type=jnp.float32) + bho_ref[...]   # (T*B, Op) f32
    m = jnp.max(logits, axis=-1, keepdims=True)
    e = jnp.exp(logits - m)                                          # pad lanes -> exp(-1e30)=0
    out_ref[...] = e / jnp.sum(e, axis=-1, keepdims=True)            # exact divide (rows sum to 1)

    h1_ref[...] = h_f32
    c1_ref[...] = c


def _pad_gate_lanes(x, H, Hp):
    """(..., 4*H) -> (..., 4*Hp): gate g's H values land on lanes [g*Hp, g*Hp+H)."""
    lead = x.shape[:-1]
    x4 = x.reshape(lead + (4, H))
    x4 = jnp.pad(x4, [(0, 0)] * len(lead) + [(0, 0), (0, Hp - H)])
    return x4.reshape(lead + (4 * Hp,))


def prepare_params(params, Hp=HP, Op=OP):
    """PyTorch-layout CharRNN(LSTM) params -> folded / padded kernel layout."""
    V, H = params["embed"].shape
    O = params["w_ho"].shape[0]
    # Fold embedding into the input-to-hidden projection: per-token gate pre-activations.
    table = params["embed"] @ params["w_ih"].T                       # (V, 4H) f32
    b_all = (params["b_ih"].reshape(-1) + params["b_hh"].reshape(-1)).reshape(1, 4 * H)
    # Recurrent weights, gate axis on lanes, contraction dim padded to Hp.
    whh = _pad_gate_lanes(params["w_hh"].T, H, Hp)                   # (H, 4*Hp)
    whh = jnp.pad(whh, [(0, Hp - H), (0, 0)])                        # (Hp, 4*Hp)
    # Output projection, padded to (Hp, Op); bias pad = -1e30 so softmax ignores pad lanes.
    who = jnp.pad(params["w_ho"].T, [(0, Hp - H), (0, Op - O)])      # (Hp, Op)
    bho = jnp.concatenate([params["b_ho"].reshape(-1),
                           jnp.full((Op - O,), -1e30, jnp.float32)]).reshape(1, Op)
    return {
        "table": _pad_gate_lanes(table, H, Hp).astype(jnp.bfloat16),      # (V, 4*Hp)
        "b_gates": _pad_gate_lanes(b_all, H, Hp).astype(jnp.float32),     # (1, 4*Hp)
        "w_hh": whh.astype(jnp.bfloat16),                                 # (Hp, 4*Hp)
        "w_ho": who.astype(jnp.bfloat16),                                 # (Hp, Op)
        "b_ho": bho.astype(jnp.float32),                                  # (1, Op)
        "H": H, "O": O, "Hp": Hp, "Op": Op,
    }


def char_rnn_forward_seq(tokens_seq, hidden, prepped):
    """Run T LSTM steps in ONE pallas_call.

    tokens_seq: (T, B) int32 token ids; hidden: (h0, c0) each (1, B, H).
    Returns (probs (T, B, O), (h1 (1,B,H), c1 (1,B,H))).
    """
    h0, c0 = hidden
    T, B = tokens_seq.shape
    H, O, Hp, Op = prepped["H"], prepped["O"], prepped["Hp"], prepped["Op"]

    h0p = jnp.zeros((B, Hp), jnp.float32).at[:, :H].set(h0.reshape(B, H).astype(jnp.float32))
    c0p = jnp.zeros((B, Hp), jnp.float32).at[:, :H].set(c0.reshape(B, H).astype(jnp.float32))

    vmem = pl.BlockSpec(memory_space=pltpu.MemorySpace.VMEM)
    out, h1p, c1p = pl.pallas_call(
        _char_rnn_lstm_seq_kernel,
        out_shape=(
            jax.ShapeDtypeStruct((T * B, Op), jnp.float32),   # per-step softmax (lane-dense)
            jax.ShapeDtypeStruct((B, Hp), jnp.float32),       # h1
            jax.ShapeDtypeStruct((B, Hp), jnp.float32),       # c1
        ),
        in_specs=[vmem] * 8,
        out_specs=(vmem, vmem, vmem),
        scratch_shapes=[pltpu.VMEM((T * B, Hp), jnp.float32)],   # h_t history for epilogue
        # h0 -> h1, c0 -> c1 share HBM buffers (in-place state update).
        input_output_aliases={6: 1, 7: 2},
    )(
        tokens_seq.astype(jnp.int32).reshape(T * B, 1),
        prepped["table"], prepped["b_gates"], prepped["w_hh"],
        prepped["w_ho"], prepped["b_ho"],
        h0p, c0p,
    )
    probs = out[:, :O].reshape(T, B, O)
    return probs, (h1p[:, :H].reshape(1, B, H), c1p[:, :H].reshape(1, B, H))


def char_rnn_forward(tokens, hidden, prepped):
    """Single step, matching CharRNN.forward(input, hidden) for model='lstm'."""
    out, hidden = char_rnn_forward_seq(tokens.reshape(1, -1), hidden, prepped)
    return out[0], hidden


def init_params(key, input_size, hidden_size, output_size):
    """Deterministic init mirroring PyTorch parameter shapes (LSTM variant)."""
    ks = jax.random.split(key, 7)
    k = 1.0 / jnp.sqrt(hidden_size)
    u = lambda kk, shape: jax.random.uniform(kk, shape, jnp.float32, -k, k)
    return {
        "embed": jax.random.normal(ks[0], (input_size, hidden_size), jnp.float32),
        "w_ih": u(ks[1], (4 * hidden_size, hidden_size)),
        "w_hh": u(ks[2], (4 * hidden_size, hidden_size)),
        "b_ih": u(ks[3], (4 * hidden_size,)),
        "b_hh": u(ks[4], (4 * hidden_size,)),
        "w_ho": u(ks[5], (output_size, hidden_size)),
        "b_ho": u(ks[6], (output_size,)),
    }


if __name__ == "__main__":
    alphabet_size = 12    # input_size == output_size == 12
    hidden_size = 20
    n_layers = 1          # script passes batch_size=1 as n_layers
    batch = 2             # forward batch size (input.size(0))
    seq_len = 8           # timesteps fused into one kernel launch

    key = jax.random.PRNGKey(0)
    kp, kt = jax.random.split(key)
    params = init_params(kp, alphabet_size, hidden_size, alphabet_size)
    prepped = prepare_params(params)

    tokens_seq = jax.random.randint(kt, (seq_len, batch), 0, alphabet_size, dtype=jnp.int32)
    # init_hidden for LSTM: zeros (n_layers, batch, hidden)
    h0 = jnp.zeros((n_layers, batch, hidden_size), jnp.float32)
    c0 = jnp.zeros((n_layers, batch, hidden_size), jnp.float32)

    # Multi-step decode: all seq_len LSTM steps inside a single pallas_call.
    out_seq, (h1, c1) = char_rnn_forward_seq(tokens_seq, (h0, c0), prepped)
    # Single-step API (exactly the PyTorch forward), continuing from that state.
    out_1, (h2, c2) = char_rnn_forward(tokens_seq[0], (h1, c1), prepped)
    jax.block_until_ready((out_seq, out_1, h2, c2))

    assert out_seq.shape == (seq_len, batch, alphabet_size)
    assert out_1.shape == (batch, alphabet_size)
    assert h2.shape == (n_layers, batch, hidden_size)
    assert c2.shape == (n_layers, batch, hidden_size)
    # softmax rows must sum to 1 (exact f32 divide is kept)
    assert bool(jnp.allclose(jnp.sum(out_seq, axis=-1), 1.0, atol=1e-5))
    assert bool(jnp.allclose(jnp.sum(out_1, axis=-1), 1.0, atol=1e-5))
    assert bool(jnp.all(jnp.isfinite(out_seq)))
    print("KERNEL_OK")
</pallas_src>

<mosaic_0001>
module attributes {stable_mosaic.version = 11 : i64} {
  func.func @_char_rnn_lstm_seq_kernel(%arg0: memref<16x1xi32, #tpu.memory_space<vmem>>, %arg1: memref<12x512xbf16, #tpu.memory_space<vmem>>, %arg2: memref<1x512xf32, #tpu.memory_space<vmem>>, %arg3: memref<128x512xbf16, #tpu.memory_space<vmem>>, %arg4: memref<128x128xbf16, #tpu.memory_space<vmem>>, %arg5: memref<1x128xf32, #tpu.memory_space<vmem>>, %arg6: memref<2x128xf32, #tpu.memory_space<vmem>>, %arg7: memref<2x128xf32, #tpu.memory_space<vmem>>, %arg8: memref<16x128xf32, #tpu.memory_space<vmem>>, %arg9: memref<2x128xf32, #tpu.memory_space<vmem>>, %arg10: memref<2x128xf32, #tpu.memory_space<vmem>>, %arg11: memref<16x128xf32, #tpu.memory_space<vmem>>) attributes {dimension_semantics = [], scalar_prefetch = 0 : i64, scratch_operands = 1 : i64, tpu.core_type = #tpu.core_type<tc>} {
    %c0 = arith.constant 0 : index
    %c0_0 = arith.constant 0 : index
    %0 = vector.load %arg1[%c0, %c0_0] : memref<12x512xbf16, #tpu.memory_space<vmem>>, vector<12x512xbf16>
    %c0_1 = arith.constant 0 : index
    %c0_2 = arith.constant 0 : index
    %1 = vector.load %arg2[%c0_1, %c0_2] : memref<1x512xf32, #tpu.memory_space<vmem>>, vector<1x512xf32>
    %c0_3 = arith.constant 0 : index
    %c0_4 = arith.constant 0 : index
    %2 = vector.load %arg3[%c0_3, %c0_4] : memref<128x512xbf16, #tpu.memory_space<vmem>>, vector<128x512xbf16>
    %c0_5 = arith.constant 0 : index
    %c0_6 = arith.constant 0 : index
    %3 = vector.load %arg0[%c0_5, %c0_6] : memref<16x1xi32, #tpu.memory_space<vmem>>, vector<16x1xi32>
    %4 = tpu.iota {dimensions = array<i32: 1>} : vector<16x12xi32>
    %5 = vector.broadcast %3 : vector<16x1xi32> to vector<16x12xi32>
    %6 = arith.cmpi eq, %4, %5 : vector<16x12xi32>
    %7 = arith.extui %6 : vector<16x12xi1> to vector<16x12xi32>
    %8 = arith.sitofp %7 : vector<16x12xi32> to vector<16x12xf32>
    %9 = arith.truncf %8 : vector<16x12xf32> to vector<16x12xbf16>
    %cst = arith.constant dense<0.000000e+00> : vector<16x512xf32>
    %10 = tpu.matmul %9, %0, %cst {dimension_numbers = #tpu.dot_dimension_numbers<[1], [0], [0], [1], [0, 0, 1, 1], [], []>} : vector<16x12xbf16>, vector<12x512xbf16>, vector<16x512xf32> -> vector<16x512xf32>
    %11 = vector.broadcast %1 : vector<1x512xf32> to vector<16x512xf32>
    %12 = arith.addf %10, %11 : vector<16x512xf32>
    %c0_7 = arith.constant 0 : index
    %c0_8 = arith.constant 0 : index
    %13 = vector.load %arg6[%c0_7, %c0_8] : memref<2x128xf32, #tpu.memory_space<vmem>>, vector<2x128xf32>
    %14 = arith.truncf %13 : vector<2x128xf32> to vector<2x128xbf16>
    %c0_9 = arith.constant 0 : index
    %c0_10 = arith.constant 0 : index
    %15 = vector.load %arg7[%c0_9, %c0_10] : memref<2x128xf32, #tpu.memory_space<vmem>>, vector<2x128xf32>
    %cst_11 = arith.constant dense<0.000000e+00> : vector<2x512xf32>
    %16 = tpu.matmul %14, %2, %cst_11 {dimension_numbers = #tpu.dot_dimension_numbers<[1], [0], [0], [1], [0, 0, 1, 1], [], []>} : vector<2x128xbf16>, vector<128x512xbf16>, vector<2x512xf32> -> vector<2x512xf32>
    %17 = vector.extract_strided_slice %12 {offsets = [0, 0], sizes = [2, 512], strides = [1, 1]} : vector<16x512xf32> to vector<2x512xf32>
    %18 = arith.addf %17, %16 : vector<2x512xf32>
    %19 = vector.extract_strided_slice %18 {offsets = [0, 0], sizes = [2, 128], strides = [1, 1]} : vector<2x512xf32> to vector<2x128xf32>
    %20 = arith.negf %19 : vector<2x128xf32>
    %21 = math.exp %20 : vector<2x128xf32>
    %cst_12 = arith.constant 1.000000e+00 : f32
    %22 = vector.broadcast %cst_12 : f32 to vector<2x128xf32>
    %23 = arith.addf %22, %21 : vector<2x128xf32>
    %24 = arith.divf %22, %23 : vector<2x128xf32>
    %25 = vector.extract_strided_slice %18 {offsets = [0, 128], sizes = [2, 128], strides = [1, 1]} : vector<2x512xf32> to vector<2x128xf32>
    %26 = arith.negf %25 : vector<2x128xf32>
    %27 = math.exp %26 : vector<2x128xf32>
    %cst_13 = arith.constant 1.000000e+00 : f32
    %28 = vector.broadcast %cst_13 : f32 to vector<2x128xf32>
    %29 = arith.addf %28, %27 : vector<2x128xf32>
    %30 = arith.divf %28, %29 : vector<2x128xf32>
    %31 = vector.extract_strided_slice %18 {offsets = [0, 256], sizes = [2, 128], strides = [1, 1]} : vector<2x512xf32> to vector<2x128xf32>
    %32 = math.tanh %31 : vector<2x128xf32>
    %33 = vector.extract_strided_slice %18 {offsets = [0, 384], sizes = [2, 128], strides = [1, 1]} : vector<2x512xf32> to vector<2x128xf32>
    %34 = arith.negf %33 : vector<2x128xf32>
    %35 = math.exp %34 : vector<2x128xf32>
    %cst_14 = arith.constant 1.000000e+00 : f32
    %36 = vector.broadcast %cst_14 : f32 to vector<2x128xf32>
    %37 = arith.addf %36, %35 : vector<2x128xf32>
    %38 = arith.divf %36, %37 : vector<2x128xf32>
    %39 = arith.mulf %30, %15 : vector<2x128xf32>
    %40 = arith.mulf %24, %32 : vector<2x128xf32>
    %41 = arith.addf %39, %40 : vector<2x128xf32>
    %42 = math.tanh %41 : vector<2x128xf32>
    %43 = arith.mulf %38, %42 : vector<2x128xf32>
    %c0_15 = arith.constant 0 : index
    %c0_16 = arith.constant 0 : index
    %44 = vector.load %arg11[%c0_15, %c0_16] : memref<16x128xf32, #tpu.memory_space<vmem>>, vector<2x128xf32>
    tpu.vector_store %arg11[%c0_15, %c0_16], %43 {strides = array<i32>} : memref<16x128xf32, #tpu.memory_space<vmem>>, vector<2x128xf32>,
    %45 = arith.truncf %43 : vector<2x128xf32> to vector<2x128xbf16>
    %cst_17 = arith.constant dense<0.000000e+00> : vector<2x512xf32>
    %46 = tpu.matmul %45, %2, %cst_17 {dimension_numbers = #tpu.dot_dimension_numbers<[1], [0], [0], [1], [0, 0, 1, 1], [], []>} : vector<2x128xbf16>, vector<128x512xbf16>, vector<2x512xf32> -> vector<2x512xf32>
    %47 = vector.extract_strided_slice %12 {offsets = [2, 0], sizes = [2, 512], strides = [1, 1]} : vector<16x512xf32> to vector<2x512xf32>
    %48 = arith.addf %47, %46 : vector<2x512xf32>
    %49 = vector.extract_strided_slice %48 {offsets = [0, 0], sizes = [2, 128], strides = [1, 1]} : vector<2x512xf32> to vector<2x128xf32>
    %50 = arith.negf %49 : vector<2x128xf32>
    %51 = math.exp %50 : vector<2x128xf32>
    %cst_18 = arith.constant 1.000000e+00 : f32
    %52 = vector.broadcast %cst_18 : f32 to vector<2x128xf32>
    %53 = arith.addf %52, %51 : vector<2x128xf32>
    %54 = arith.divf %52, %53 : vector<2x128xf32>
    %55 = vector.extract_strided_slice %48 {offsets = [0, 128], sizes = [2, 128], strides = [1, 1]} : vector<2x512xf32> to vector<2x128xf32>
    %56 = arith.negf %55 : vector<2x128xf32>
    %57 = math.exp %56 : vector<2x128xf32>
    %cst_19 = arith.constant 1.000000e+00 : f32
    %58 = vector.broadcast %cst_19 : f32 to vector<2x128xf32>
    %59 = arith.addf %58, %57 : vector<2x128xf32>
    %60 = arith.divf %58, %59 : vector<2x128xf32>
    %61 = vector.extract_strided_slice %48 {offsets = [0, 256], sizes = [2, 128], strides = [1, 1]} : vector<2x512xf32> to vector<2x128xf32>
    %62 = math.tanh %61 : vector<2x128xf32>
    %63 = vector.extract_strided_slice %48 {offsets = [0, 384], sizes = [2, 128], strides = [1, 1]} : vector<2x512xf32> to vector<2x128xf32>
    %64 = arith.negf %63 : vector<2x128xf32>
    %65 = math.exp %64 : vector<2x128xf32>
    %cst_20 = arith.constant 1.000000e+00 : f32
    %66 = vector.broadcast %cst_20 : f32 to vector<2x128xf32>
    %67 = arith.addf %66, %65 : vector<2x128xf32>
    %68 = arith.divf %66, %67 : vector<2x128xf32>
    %69 = arith.mulf %60, %41 : vector<2x128xf32>
    %70 = arith.mulf %54, %62 : vector<2x128xf32>
    %71 = arith.addf %69, %70 : vector<2x128xf32>
    %72 = math.tanh %71 : vector<2x128xf32>
    %73 = arith.mulf %68, %72 : vector<2x128xf32>
    %c2 = arith.constant 2 : index
    %c0_21 = arith.constant 0 : index
    %74 = vector.load %arg11[%c2, %c0_21] : memref<16x128xf32, #tpu.memory_space<vmem>>, vector<2x128xf32>
    tpu.vector_store %arg11[%c2, %c0_21], %73 {strides = array<i32>} : memref<16x128xf32, #tpu.memory_space<vmem>>, vector<2x128xf32>,
    %75 = arith.truncf %73 : vector<2x128xf32> to vector<2x128xbf16>
    %cst_22 = arith.constant dense<0.000000e+00> : vector<2x512xf32>
    %76 = tpu.matmul %75, %2, %cst_22 {dimension_numbers = #tpu.dot_dimension_numbers<[1], [0], [0], [1], [0, 0, 1, 1], [], []>} : vector<2x128xbf16>, vector<128x512xbf16>, vector<2x512xf32> -> vector<2x512xf32>
    %77 = vector.extract_strided_slice %12 {offsets = [4, 0], sizes = [2, 512], strides = [1, 1]} : vector<16x512xf32> to vector<2x512xf32>
    %78 = arith.addf %77, %76 : vector<2x512xf32>
    %79 = vector.extract_strided_slice %78 {offsets = [0, 0], sizes = [2, 128], strides = [1, 1]} : vector<2x512xf32> to vector<2x128xf32>
    %80 = arith.negf %79 : vector<2x128xf32>
    %81 = math.exp %80 : vector<2x128xf32>
    %cst_23 = arith.constant 1.000000e+00 : f32
    %82 = vector.broadcast %cst_23 : f32 to vector<2x128xf32>
    %83 = arith.addf %82, %81 : vector<2x128xf32>
    %84 = arith.divf %82, %83 : vector<2x128xf32>
    %85 = vector.extract_strided_slice %78 {offsets = [0, 128], sizes = [2, 128], strides = [1, 1]} : vector<2x512xf32> to vector<2x128xf32>
    %86 = arith.negf %85 : vector<2x128xf32>
    %87 = math.exp %86 : vector<2x128xf32>
    %cst_24 = arith.constant 1.000000e+00 : f32
    %88 = vector.broadcast %cst_24 : f32 to vector<2x128xf32>
    %89 = arith.addf %88, %87 : vector<2x128xf32>
    %90 = arith.divf %88, %89 : vector<2x128xf32>
    %91 = vector.extract_strided_slice %78 {offsets = [0, 256], sizes = [2, 128], strides = [1, 1]} : vector<2x512xf32> to vector<2x128xf32>
    %92 = math.tanh %91 : vector<2x128xf32>
    %93 = vector.extract_strided_slice %78 {offsets = [0, 384], sizes = [2, 128], strides = [1, 1]} : vector<2x512xf32> to vector<2x128xf32>
    %94 = arith.negf %93 : vector<2x128xf32>
    %95 = math.exp %94 : vector<2x128xf32>
    %cst_25 = arith.constant 1.000000e+00 : f32
    %96 = vector.broadcast %cst_25 : f32 to vector<2x128xf32>
    %97 = arith.addf %96, %95 : vector<2x128xf32>
    %98 = arith.divf %96, %97 : vector<2x128xf32>
    %99 = arith.mulf %90, %71 : vector<2x128xf32>
    %100 = arith.mulf %84, %92 : vector<2x128xf32>
    %101 = arith.addf %99, %100 : vector<2x128xf32>
    %102 = math.tanh %101 : vector<2x128xf32>
    %103 = arith.mulf %98, %102 : vector<2x128xf32>
    %c4 = arith.constant 4 : index
    %c0_26 = arith.constant 0 : index
    %104 = vector.load %arg11[%c4, %c0_26] : memref<16x128xf32, #tpu.memory_space<vmem>>, vector<2x128xf32>
    tpu.vector_store %arg11[%c4, %c0_26], %103 {strides = array<i32>} : memref<16x128xf32, #tpu.memory_space<vmem>>, vector<2x128xf32>,
    %105 = arith.truncf %103 : vector<2x128xf32> to vector<2x128xbf16>
    %cst_27 = arith.constant dense<0.000000e+00> : vector<2x512xf32>
    %106 = tpu.matmul %105, %2, %cst_27 {dimension_numbers = #tpu.dot_dimension_numbers<[1], [0], [0], [1], [0, 0, 1, 1], [], []>} : vector<2x128xbf16>, vector<128x512xbf16>, vector<2x512xf32> -> vector<2x512xf32>
    %107 = vector.extract_strided_slice %12 {offsets = [6, 0], sizes = [2, 512], strides = [1, 1]} : vector<16x512xf32> to vector<2x512xf32>
    %108 = arith.addf %107, %106 : vector<2x512xf32>
    %109 = vector.extract_strided_slice %108 {offsets = [0, 0], sizes = [2, 128], strides = [1, 1]} : vector<2x512xf32> to vector<2x128xf32>
    %110 = arith.negf %109 : vector<2x128xf32>
    %111 = math.exp %110 : vector<2x128xf32>
    %cst_28 = arith.constant 1.000000e+00 : f32
    %112 = vector.broadcast %cst_28 : f32 to vector<2x128xf32>
    %113 = arith.addf %112, %111 : vector<2x128xf32>
    %114 = arith.divf %112, %113 : vector<2x128xf32>
    %115 = vector.extract_strided_slice %108 {offsets = [0, 128], sizes = [2, 128], strides = [1, 1]} : vector<2x512xf32> to vector<2x128xf32>
    %116 = arith.negf %115 : vector<2x128xf32>
    %117 = math.exp %116 : vector<2x128xf32>
    %cst_29 = arith.constant 1.000000e+00 : f32
    %118 = vector.broadcast %cst_29 : f32 to vector<2x128xf32>
    %119 = arith.addf %118, %117 : vector<2x128xf32>
    %120 = arith.divf %118, %119 : vector<2x128xf32>
    %121 = vector.extract_strided_slice %108 {offsets = [0, 256], sizes = [2, 128], strides = [1, 1]} : vector<2x512xf32> to vector<2x128xf32>
    %122 = math.tanh %121 : vector<2x128xf32>
    %123 = vector.extract_strided_slice %108 {offsets = [0, 384], sizes = [2, 128], strides = [1, 1]} : vector<2x512xf32> to vector<2x128xf32>
    %124 = arith.negf %123 : vector<2x128xf32>
    %125 = math.exp %124 : vector<2x128xf32>
    %cst_30 = arith.constant 1.000000e+00 : f32
    %126 = vector.broadcast %cst_30 : f32 to vector<2x128xf32>
    %127 = arith.addf %126, %125 : vector<2x128xf32>
    %128 = arith.divf %126, %127 : vector<2x128xf32>
    %129 = arith.mulf %120, %101 : vector<2x128xf32>
    %130 = arith.mulf %114, %122 : vector<2x128xf32>
    %131 = arith.addf %129, %130 : vector<2x128xf32>
    %132 = math.tanh %131 : vector<2x128xf32>
    %133 = arith.mulf %128, %132 : vector<2x128xf32>
    %c6 = arith.constant 6 : index
    %c0_31 = arith.constant 0 : index
    %134 = vector.load %arg11[%c6, %c0_31] : memref<16x128xf32, #tpu.memory_space<vmem>>, vector<2x128xf32>
    tpu.vector_store %arg11[%c6, %c0_31], %133 {strides = array<i32>} : memref<16x128xf32, #tpu.memory_space<vmem>>, vector<2x128xf32>,
    %135 = arith.truncf %133 : vector<2x128xf32> to vector<2x128xbf16>
    %cst_32 = arith.constant dense<0.000000e+00> : vector<2x512xf32>
    %136 = tpu.matmul %135, %2, %cst_32 {dimension_numbers = #tpu.dot_dimension_numbers<[1], [0], [0], [1], [0, 0, 1, 1], [], []>} : vector<2x128xbf16>, vector<128x512xbf16>, vector<2x512xf32> -> vector<2x512xf32>
    %137 = vector.extract_strided_slice %12 {offsets = [8, 0], sizes = [2, 512], strides = [1, 1]} : vector<16x512xf32> to vector<2x512xf32>
    %138 = arith.addf %137, %136 : vector<2x512xf32>
    %139 = vector.extract_strided_slice %138 {offsets = [0, 0], sizes = [2, 128], strides = [1, 1]} : vector<2x512xf32> to vector<2x128xf32>
    %140 = arith.negf %139 : vector<2x128xf32>
    %141 = math.exp %140 : vector<2x128xf32>
    %cst_33 = arith.constant 1.000000e+00 : f32
    %142 = vector.broadcast %cst_33 : f32 to vector<2x128xf32>
    %143 = arith.addf %142, %141 : vector<2x128xf32>
    %144 = arith.divf %142, %143 : vector<2x128xf32>
    %145 = vector.extract_strided_slice %138 {offsets = [0, 128], sizes = [2, 128], strides = [1, 1]} : vector<2x512xf32> to vector<2x128xf32>
    %146 = arith.negf %145 : vector<2x128xf32>
    %147 = math.exp %146 : vector<2x128xf32>
    %cst_34 = arith.constant 1.000000e+00 : f32
    %148 = vector.broadcast %cst_34 : f32 to vector<2x128xf32>
    %149 = arith.addf %148, %147 : vector<2x128xf32>
    %150 = arith.divf %148, %149 : vector<2x128xf32>
    %151 = vector.extract_strided_slice %138 {offsets = [0, 256], sizes = [2, 128], strides = [1, 1]} : vector<2x512xf32> to vector<2x128xf32>
    %152 = math.tanh %151 : vector<2x128xf32>
    %153 = vector.extract_strided_slice %138 {offsets = [0, 384], sizes = [2, 128], strides = [1, 1]} : vector<2x512xf32> to vector<2x128xf32>
    %154 = arith.negf %153 : vector<2x128xf32>
    %155 = math.exp %154 : vector<2x128xf32>
    %cst_35 = arith.constant 1.000000e+00 : f32
    %156 = vector.broadcast %cst_35 : f32 to vector<2x128xf32>
    %157 = arith.addf %156, %155 : vector<2x128xf32>
    %158 = arith.divf %156, %157 : vector<2x128xf32>
    %159 = arith.mulf %150, %131 : vector<2x128xf32>
    %160 = arith.mulf %144, %152 : vector<2x128xf32>
    %161 = arith.addf %159, %160 : vector<2x128xf32>
    %162 = math.tanh %161 : vector<2x128xf32>
    %163 = arith.mulf %158, %162 : vector<2x128xf32>
    %c8 = arith.constant 8 : index
    %c0_36 = arith.constant 0 : index
    %164 = vector.load %arg11[%c8, %c0_36] : memref<16x128xf32, #tpu.memory_space<vmem>>, vector<2x128xf32>
    tpu.vector_store %arg11[%c8, %c0_36], %163 {strides = array<i32>} : memref<16x128xf32, #tpu.memory_space<vmem>>, vector<2x128xf32>,
    %165 = arith.truncf %163 : vector<2x128xf32> to vector<2x128xbf16>
    %cst_37 = arith.constant dense<0.000000e+00> : vector<2x512xf32>
    %166 = tpu.matmul %165, %2, %cst_37 {dimension_numbers = #tpu.dot_dimension_numbers<[1], [0], [0], [1], [0, 0, 1, 1], [], []>} : vector<2x128xbf16>, vector<128x512xbf16>, vector<2x512xf32> -> vector<2x512xf32>
    %167 = vector.extract_strided_slice %12 {offsets = [10, 0], sizes = [2, 512], strides = [1, 1]} : vector<16x512xf32> to vector<2x512xf32>
    %168 = arith.addf %167, %166 : vector<2x512xf32>
    %169 = vector.extract_strided_slice %168 {offsets = [0, 0], sizes = [2, 128], strides = [1, 1]} : vector<2x512xf32> to vector<2x128xf32>
    %170 = arith.negf %169 : vector<2x128xf32>
    %171 = math.exp %170 : vector<2x128xf32>
    %cst_38 = arith.constant 1.000000e+00 : f32
    %172 = vector.broadcast %cst_38 : f32 to vector<2x128xf32>
    %173 = arith.addf %172, %171 : vector<2x128xf32>
    %174 = arith.divf %172, %173 : vector<2x128xf32>
    %175 = vector.extract_strided_slice %168 {offsets = [0, 128], sizes = [2, 128], strides = [1, 1]} : vector<2x512xf32> to vector<2x128xf32>
    %176 = arith.negf %175 : vector<2x128xf32>
    %177 = math.exp %176 : vector<2x128xf32>
    %cst_39 = arith.constant 1.000000e+00 : f32
    %178 = vector.broadcast %cst_39 : f32 to vector<2x128xf32>
    %179 = arith.addf %178, %177 : vector<2x128xf32>
    %180 = arith.divf %178, %179 : vector<2x128xf32>
    %181 = vector.extract_strided_slice %168 {offsets = [0, 256], sizes = [2, 128], strides = [1, 1]} : vector<2x512xf32> to vector<2x128xf32>
    %182 = math.tanh %181 : vector<2x128xf32>
    %183 = vector.extract_strided_slice %168 {offsets = [0, 384], sizes = [2, 128], strides = [1, 1]} : vector<2x512xf32> to vector<2x128xf32>
    %184 = arith.negf %183 : vector<2x128xf32>
    %185 = math.exp %184 : vector<2x128xf32>
    %cst_40 = arith.constant 1.000000e+00 : f32
    %186 = vector.broadcast %cst_40 : f32 to vector<2x128xf32>
    %187 = arith.addf %186, %185 : vector<2x128xf32>
    %188 = arith.divf %186, %187 : vector<2x128xf32>
    %189 = arith.mulf %180, %161 : vector<2x128xf32>
    %190 = arith.mulf %174, %182 : vector<2x128xf32>
    %191 = arith.addf %189, %190 : vector<2x128xf32>
    %192 = math.tanh %191 : vector<2x128xf32>
    %193 = arith.mulf %188, %192 : vector<2x128xf32>
    %c10 = arith.constant 10 : index
    %c0_41 = arith.constant 0 : index
    %194 = vector.load %arg11[%c10, %c0_41] : memref<16x128xf32, #tpu.memory_space<vmem>>, vector<2x128xf32>
    tpu.vector_store %arg11[%c10, %c0_41], %193 {strides = array<i32>} : memref<16x128xf32, #tpu.memory_space<vmem>>, vector<2x128xf32>,
    %195 = arith.truncf %193 : vector<2x128xf32> to vector<2x128xbf16>
    %cst_42 = arith.constant dense<0.000000e+00> : vector<2x512xf32>
    %196 = tpu.matmul %195, %2, %cst_42 {dimension_numbers = #tpu.dot_dimension_numbers<[1], [0], [0], [1], [0, 0, 1, 1], [], []>} : vector<2x128xbf16>, vector<128x512xbf16>, vector<2x512xf32> -> vector<2x512xf32>
    %197 = vector.extract_strided_slice %12 {offsets = [12, 0], sizes = [2, 512], strides = [1, 1]} : vector<16x512xf32> to vector<2x512xf32>
    %198 = arith.addf %197, %196 : vector<2x512xf32>
    %199 = vector.extract_strided_slice %198 {offsets = [0, 0], sizes = [2, 128], strides = [1, 1]} : vector<2x512xf32> to vector<2x128xf32>
    %200 = arith.negf %199 : vector<2x128xf32>
    %201 = math.exp %200 : vector<2x128xf32>
    %cst_43 = arith.constant 1.000000e+00 : f32
    %202 = vector.broadcast %cst_43 : f32 to vector<2x128xf32>
    %203 = arith.addf %202, %201 : vector<2x128xf32>
    %204 = arith.divf %202, %203 : vector<2x128xf32>
    %205 = vector.extract_strided_slice %198 {offsets = [0, 128], sizes = [2, 128], strides = [1, 1]} : vector<2x512xf32> to vector<2x128xf32>
    %206 = arith.negf %205 : vector<2x128xf32>
    %207 = math.exp %206 : vector<2x128xf32>
    %cst_44 = arith.constant 1.000000e+00 : f32
    %208 = vector.broadcast %cst_44 : f32 to vector<2x128xf32>
    %209 = arith.addf %208, %207 : vector<2x128xf32>
    %210 = arith.divf %208, %209 : vector<2x128xf32>
    %211 = vector.extract_strided_slice %198 {offsets = [0, 256], sizes = [2, 128], strides = [1, 1]} : vector<2x512xf32> to vector<2x128xf32>
    %212 = math.tanh %211 : vector<2x128xf32>
    %213 = vector.extract_strided_slice %198 {offsets = [0, 384], sizes = [2, 128], strides = [1, 1]} : vector<2x512xf32> to vector<2x128xf32>
    %214 = arith.negf %213 : vector<2x128xf32>
    %215 = math.exp %214 : vector<2x128xf32>
    %cst_45 = arith.constant 1.000000e+00 : f32
    %216 = vector.broadcast %cst_45 : f32 to vector<2x128xf32>
    %217 = arith.addf %216, %215 : vector<2x128xf32>
    %218 = arith.divf %216, %217 : vector<2x128xf32>
    %219 = arith.mulf %210, %191 : vector<2x128xf32>
    %220 = arith.mulf %204, %212 : vector<2x128xf32>
    %221 = arith.addf %219, %220 : vector<2x128xf32>
    %222 = math.tanh %221 : vector<2x128xf32>
    %223 = arith.mulf %218, %222 : vector<2x128xf32>
    %c12 = arith.constant 12 : index
    %c0_46 = arith.constant 0 : index
    %224 = vector.load %arg11[%c12, %c0_46] : memref<16x128xf32, #tpu.memory_space<vmem>>, vector<2x128xf32>
    tpu.vector_store %arg11[%c12, %c0_46], %223 {strides = array<i32>} : memref<16x128xf32, #tpu.memory_space<vmem>>, vector<2x128xf32>,
    %225 = arith.truncf %223 : vector<2x128xf32> to vector<2x128xbf16>
    %cst_47 = arith.constant dense<0.000000e+00> : vector<2x512xf32>
    %226 = tpu.matmul %225, %2, %cst_47 {dimension_numbers = #tpu.dot_dimension_numbers<[1], [0], [0], [1], [0, 0, 1, 1], [], []>} : vector<2x128xbf16>, vector<128x512xbf16>, vector<2x512xf32> -> vector<2x512xf32>
    %227 = vector.extract_strided_slice %12 {offsets = [14, 0], sizes = [2, 512], strides = [1, 1]} : vector<16x512xf32> to vector<2x512xf32>
    %228 = arith.addf %227, %226 : vector<2x512xf32>
    %229 = vector.extract_strided_slice %228 {offsets = [0, 0], sizes = [2, 128], strides = [1, 1]} : vector<2x512xf32> to vector<2x128xf32>
    %230 = arith.negf %229 : vector<2x128xf32>
    %231 = math.exp %230 : vector<2x128xf32>
    %cst_48 = arith.constant 1.000000e+00 : f32
    %232 = vector.broadcast %cst_48 : f32 to vector<2x128xf32>
    %233 = arith.addf %232, %231 : vector<2x128xf32>
    %234 = arith.divf %232, %233 : vector<2x128xf32>
    %235 = vector.extract_strided_slice %228 {offsets = [0, 128], sizes = [2, 128], strides = [1, 1]} : vector<2x512xf32> to vector<2x128xf32>
    %236 = arith.negf %235 : vector<2x128xf32>
    %237 = math.exp %236 : vector<2x128xf32>
    %cst_49 = arith.constant 1.000000e+00 : f32
    %238 = vector.broadcast %cst_49 : f32 to vector<2x128xf32>
    %239 = arith.addf %238, %237 : vector<2x128xf32>
    %240 = arith.divf %238, %239 : vector<2x128xf32>
    %241 = vector.extract_strided_slice %228 {offsets = [0, 256], sizes = [2, 128], strides = [1, 1]} : vector<2x512xf32> to vector<2x128xf32>
    %242 = math.tanh %241 : vector<2x128xf32>
    %243 = vector.extract_strided_slice %228 {offsets = [0, 384], sizes = [2, 128], strides = [1, 1]} : vector<2x512xf32> to vector<2x128xf32>
    %244 = arith.negf %243 : vector<2x128xf32>
    %245 = math.exp %244 : vector<2x128xf32>
    %cst_50 = arith.constant 1.000000e+00 : f32
    %246 = vector.broadcast %cst_50 : f32 to vector<2x128xf32>
    %247 = arith.addf %246, %245 : vector<2x128xf32>
    %248 = arith.divf %246, %247 : vector<2x128xf32>
    %249 = arith.mulf %240, %221 : vector<2x128xf32>
    %250 = arith.mulf %234, %242 : vector<2x128xf32>
    %251 = arith.addf %249, %250 : vector<2x128xf32>
    %252 = math.tanh %251 : vector<2x128xf32>
    %253 = arith.mulf %248, %252 : vector<2x128xf32>
    %c14 = arith.constant 14 : index
    %c0_51 = arith.constant 0 : index
    %254 = vector.load %arg11[%c14, %c0_51] : memref<16x128xf32, #tpu.memory_space<vmem>>, vector<2x128xf32>
    tpu.vector_store %arg11[%c14, %c0_51], %253 {strides = array<i32>} : memref<16x128xf32, #tpu.memory_space<vmem>>, vector<2x128xf32>,
    %c0_52 = arith.constant 0 : index
    %c0_53 = arith.constant 0 : index
    %255 = vector.load %arg11[%c0_52, %c0_53] : memref<16x128xf32, #tpu.memory_space<vmem>>, vector<16x128xf32>
    %256 = arith.truncf %255 : vector<16x128xf32> to vector<16x128xbf16>
    %c0_54 = arith.constant 0 : index
    %c0_55 = arith.constant 0 : index
    %257 = vector.load %arg4[%c0_54, %c0_55] : memref<128x128xbf16, #tpu.memory_space<vmem>>, vector<128x128xbf16>
    %cst_56 = arith.constant dense<0.000000e+00> : vector<16x128xf32>
    %258 = tpu.matmul %256, %257, %cst_56 {dimension_numbers = #tpu.dot_dimension_numbers<[1], [0], [0], [1], [0, 0, 1, 1], [], []>} : vector<16x128xbf16>, vector<128x128xbf16>, vector<16x128xf32> -> vector<16x128xf32>
    %c0_57 = arith.constant 0 : index
    %c0_58 = arith.constant 0 : index
    %259 = vector.load %arg5[%c0_57, %c0_58] : memref<1x128xf32, #tpu.memory_space<vmem>>, vector<1x128xf32>
    %260 = vector.broadcast %259 : vector<1x128xf32> to vector<16x128xf32>
    %261 = arith.addf %258, %260 : vector<16x128xf32>
    %cst_59 = arith.constant dense<0xFF800000> : vector<16xf32>
    %262 = vector.multi_reduction <maximumf>, %261, %cst_59 [1] : vector<16x128xf32> to vector<16xf32>
    %263 = vector.shape_cast %262 : vector<16xf32> to vector<16x1xf32>
    %264 = vector.broadcast %263 : vector<16x1xf32> to vector<16x128xf32>
    %265 = arith.subf %261, %264 : vector<16x128xf32>
    %266 = math.exp %265 : vector<16x128xf32>
    %cst_60 = arith.constant dense<0.000000e+00> : vector<16xf32>
    %267 = vector.multi_reduction <add>, %266, %cst_60 [1] : vector<16x128xf32> to vector<16xf32>
    %268 = vector.shape_cast %267 : vector<16xf32> to vector<16x1xf32>
    %269 = vector.broadcast %268 : vector<16x1xf32> to vector<16x128xf32>
    %270 = arith.divf %266, %269 : vector<16x128xf32>
    %c0_61 = arith.constant 0 : index
    %c0_62 = arith.constant 0 : index
    %271 = vector.load %arg8[%c0_61, %c0_62] : memref<16x128xf32, #tpu.memory_space<vmem>>, vector<16x128xf32>
    tpu.vector_store %arg8[%c0_61, %c0_62], %270 {strides = array<i32>} : memref<16x128xf32, #tpu.memory_space<vmem>>, vector<16x128xf32>,
    %c0_63 = arith.constant 0 : index
    %c0_64 = arith.constant 0 : index
    %272 = vector.load %arg9[%c0_63, %c0_64] : memref<2x128xf32, #tpu.memory_space<vmem>>, vector<2x128xf32>
    tpu.vector_store %arg9[%c0_63, %c0_64], %253 {strides = array<i32>} : memref<2x128xf32, #tpu.memory_space<vmem>>, vector<2x128xf32>,
    %c0_65 = arith.constant 0 : index
    %c0_66 = arith.constant 0 : index
    %273 = vector.load %arg10[%c0_65, %c0_66] : memref<2x128xf32, #tpu.memory_space<vmem>>, vector<2x128xf32>
    tpu.vector_store %arg10[%c0_65, %c0_66], %251 {strides = array<i32>} : memref<2x128xf32, #tpu.memory_space<vmem>>, vector<2x128xf32>,
    return
  }
}

</mosaic_0001>

<bundles_post_ra>
// kernel: tpu_custom_call.1
= control target key start
LH: loop header
LB: loop body
LE: loop exit
PB: predicated region body
PF: predicated region fallthrough
CT: control target
= control target key end

     0   :  { %16 = vsyncpa [#allocation4], 0  ;;  %s2731_s0 = inlined_call_operand.vmem [shape: s32[16,1], index: 0, kind: input, shape index: {}]   ;;  %s2732_s1 = inlined_call_operand.vmem [shape: bf16[12,512], index: 1, kind: input, shape index: {}]   ;;  %s2733_s2 = inlined_call_operand.hbm [shape: f32[1,512], index: 2, kind: input, shape index: {}]   ;;  %s2734_s3 = inlined_call_operand.hbm [shape: bf16[128,512], index: 3, kind: input, shape index: {}]   ;;  %s2735_s4 = inlined_call_operand.hbm [shape: bf16[128,128], index: 4, kind: input, shape index: {}]   ;;  %s2736_s5 = inlined_call_operand.vmem [shape: f32[1,128], index: 5, kind: input, shape index: {}]   ;;  %s2737_s6 = inlined_call_operand.hbm [shape: f32[2,128], index: 6, kind: input, shape index: {}, may-alias: {6,9}]   ;;  %s2738_s7 = inlined_call_operand.hbm [shape: f32[2,128], index: 7, kind: input, shape index: {}, may-alias: {7,10}]   ;;  %s2739_s8 = inlined_call_operand.hbm [shape: f32[16,128], index: 8, kind: output, shape index: {0}]   ;;  %s2740_s9 = inlined_call_operand.hbm [shape: f32[2,128], index: 9, kind: output, shape index: {1}, may-alias: {6,9}]   ;;  %s2741_s10 = inlined_call_operand.hbm [shape: f32[2,128], index: 10, kind: output, shape index: {2}, may-alias: {7,10}]  }
   0x1   :  { %17 = vsyncpa [#allocation7], 0 }
   0x2   :  { %18 = vsyncpa [#allocation10], 0 }
   0x3   :  { %19 = vsyncpa [#allocation5], 0 }
   0x4   :  { %20 = vsyncpa [#allocation14], 0  ;;  %s2161_s13 = smov [#allocation6]  }
   0x5   :  { %s40_s14 = sshll.u32 %s2161_s13, 4  ;;  %s41_s14 = int_to_ptr.vmem [resolvable:$true] %s40_s14 }
   0x6   :  { %s1999_s15 = scalar_lea.vmem %s41_s14, 4096  ;;  %p2004_p1 = scmp.lt.s32.totalorder %s41_s14, %s41_s14 }
   0x7   :  { %p2000_p0 = scmp.ne.s32.totalorder %s41_s14, %s1999_s15  ;;  %p2005_p2 = scmp.lt.s32.totalorder %s1999_s15, %s1999_s15 }
   0x9   :  { %p2006_p3 = por %p2005_p2, %p2004_p1 }
   0xb   :  { %p2007_p4 = pnand %p2006_p3, %p2000_p0 }
   0xd   :  { %2010 = shalt.err (!%p2007_p4)
}
   0xe   :  { %s2162_s16 = smov 256   ;;  %s2163_s17 = smov 16  }
   0xf   :  { %46 = dma.hbm_to_vmem [thread:$0]  %s2734_s3, 4096, %s41_s14, [#allocation7], %s2162_s16, %s2162_s16, %s2163_s17  }
  0x10   :  { %s2164_s20 = smov [#allocation9]   ;;  %s2165_s22 = smov [#allocation3]  }
  0x11   :  { %s67_s21 = sshll.u32 %s2164_s20, 4  ;;  %s31_s23 = sshll.u32 %s2165_s22, 4  ;;  %s68_s21 = int_to_ptr.vmem [resolvable:$true] %s67_s21  ;;  %s32_s23 = int_to_ptr.vmem [resolvable:$true] %s31_s23 }
  0x12   :  { %s2019_s24 = scalar_lea.vmem %s68_s21, 32  ;;  %p2024_p6 = scmp.lt.s32.totalorder %s68_s21, %s68_s21 }
  0x13   :  { %p2020_p5 = scmp.ne.s32.totalorder %s68_s21, %s2019_s24  ;;  %p2025_p7 = scmp.lt.s32.totalorder %s2019_s24, %s2019_s24 }
  0x15   :  { %p2026_p8 = por %p2025_p7, %p2024_p6 }
  0x17   :  { %p2027_p9 = pnand %p2026_p8, %p2020_p5 }
  0x19   :  { %2030 = shalt.err (!%p2027_p9)
}
  0x1a   :  { %70 = dma.hbm_to_vmem [thread:$0]  %s2737_s6, 32, %s68_s21, [#allocation10]  }
  0x1b   :  { %s2039_s27 = scalar_lea.vmem %s32_s23, 64  ;;  %p2044_p11 = scmp.lt.s32.totalorder %s32_s23, %s32_s23 }
  0x1c   :  { %p2040_p10 = scmp.ne.s32.totalorder %s32_s23, %s2039_s27  ;;  %p2045_p12 = scmp.lt.s32.totalorder %s2039_s27, %s2039_s27 }
  0x1e   :  { %p2046_p13 = por %p2045_p12, %p2044_p11 }
  0x20   :  { %p2047_p0 = pnand %p2046_p13, %p2040_p10 }
  0x22   :  { %2050 = shalt.err (!%p2047_p0)
}
  0x23   :  { %34 = dma.hbm_to_vmem [thread:$0]  %s2733_s2, 64, %s32_s23, [#allocation4]  }
  0x24   :  { %s2166_s29 = smov [#allocation8]  }
  0x25   :  { %s52_s30 = sshll.u32 %s2166_s29, 4  ;;  %s53_s30 = int_to_ptr.vmem [resolvable:$true] %s52_s30 }
  0x26   :  { %s2059_s11 = scalar_lea.vmem %s53_s30, 1024  ;;  %p2064_p2 = scmp.lt.s32.totalorder %s53_s30, %s53_s30 }
  0x27   :  { %p2060_p1 = scmp.ne.s32.totalorder %s53_s30, %s2059_s11  ;;  %p2065_p3 = scmp.lt.s32.totalorder %s2059_s11, %s2059_s11 }
  0x29   :  { %p2066_p4 = por %p2065_p3, %p2064_p2 }
  0x2b   :  { %p2067_p5 = pnand %p2066_p4, %p2060_p1 }
  0x2d   :  { %2070 = shalt.err (!%p2067_p5)
}
  0x2e   :  { %s2167_s6 = smov 64   ;;  %s2168_s12 = smov 4  }
  0x2f   :  { %58 = dma.hbm_to_vmem [thread:$0]  %s2735_s4, 1024, %s53_s30, [#allocation7], %s2167_s6, %s2167_s6, %s2168_s12  }
  0x30   :  { %s2169_s15 = smov [#allocation11]  }
  0x31   :  { %s77_s16 = sshll.u32 %s2169_s15, 4  ;;  %s78_s16 = int_to_ptr.vmem [resolvable:$true] %s77_s16 }
  0x32   :  { %s2079_s2 = scalar_lea.vmem %s78_s16, 32  ;;  %p2084_p7 = scmp.lt.s32.totalorder %s78_s16, %s78_s16 }
  0x33   :  { %p2080_p6 = scmp.ne.s32.totalorder %s78_s16, %s2079_s2  ;;  %p2085_p8 = scmp.lt.s32.totalorder %s2079_s2, %s2079_s2 }
  0x35   :  { %p2086_p9 = por %p2085_p8, %p2084_p7 }
  0x37   :  { %p2087_p10 = pnand %p2086_p9, %p2080_p6 }
  0x39   :  { %2090 = shalt.err (!%p2087_p10)
}
  0x3a   :  { %80 = dma.hbm_to_vmem [thread:$0]  %s2738_s7, 32, %s78_s16, [#allocation10]  }
  0x3b   :  { %2151 = dma.done.wait [#allocation4], 64  }
  0x3c   :  { %2152 = vsyncadd [#allocation4], 4294967232 }
  0x3d   :  { %2153 = dma.done.wait [#allocation7], 5120  }
  0x3e   :  { %2154 = vsyncadd [#allocation7], 4294962176 }
  0x3f   :  { %2155 = dma.done.wait [#allocation10], 64  }
  0x40   :  { %2156 = vsyncadd [#allocation10], 4294967232  ;;  %v2170_v0 = vmov 0   ;;  %v134_v1 = vld [vmem:[%s2731_s0] sm:$0xff]  ;;  %v135_v2 = vld [vmem:[%s2731_s0 + $0x8] sm:$0xff]  ;;  %vm192_vm0 = vcmask 1045504   ;;  %v136_v25 = vlaneseq }
  0x41   :  { %1761 = vset.pattern.permute.xlu0 %v2170_v0  ;;  %237 = vmatprep.mubr.bf16.mxu1 %v2170_v0  ;;  %v2257_v3 = vld [vmem:[#allocation6 + $0xe4] ss:$16 sps:$4 sm:$0xff]   ;;  %v2259_v4 = vld [vmem:[#allocation6 + $0xe0] ss:$16 sps:$4 sm:$0xff]   ;;  %v2171_v30 = vmov 0.0   ;;  %vm188_vm3 = vcmask 97280  }
  0x42   :  { %486 = vmatprep.mubr.bf16.mxu0 %v2170_v0  ;;  %139 = vperm.xlu0 %1761, %v134_v1   ;;  %v2261_v5 = vld [vmem:[#allocation6 + $0xc4] ss:$16 sps:$4 sm:$0xff]   ;;  %v2265_v6 = vld [vmem:[#allocation6 + $0xc0] ss:$16 sps:$4 sm:$0xff]   ;;  %v137_v26 = vand.u32 127, %v136_v25  ;;  %v153_v55 = vshrl.u32 %v136_v25, 7 }
  0x43   :  { %454 = vmatprep.subr.bf16.mxu0 %v2257_v3  ;;  %v2268_v7 = vld [vmem:[#allocation6 + $0xa4] ss:$16 sps:$4 sm:$0xff]   ;;  %v2271_v8 = vld [vmem:[#allocation6 + $0xa0] ss:$16 sps:$4 sm:$0xff]   ;;  %v2345_v35 = vld [vmem:[#allocation6 + $0xec] ss:$16 sps:$4 sm:$0xff]  }
  0x44   :  { %455 = vmatpush1.bf16.msra.mxu0 %v2259_v4  ;;  %v2274_v9 = vld [vmem:[#allocation6 + $0x84] ss:$16 sps:$4 sm:$0xff]   ;;  %v1782_v10 = vld [vmem:[%s2732_s1 + $0x4] ss:$16 sps:$4 sm:$0x3f]   ;;  %v154_v56 = vsub.s32 0, %v153_v55 }
  0x45   :  { %456 = vmatprep.subr.bf16.mxu0 %v2261_v5  ;;  %v1785_v11 = vld [vmem:[%s2732_s1] ss:$16 sps:$4 sm:$0x3f]   ;;  %v2283_v12 = vld [vmem:[#allocation6 + $0x80] ss:$16 sps:$4 sm:$0xff]   ;;  %1646 = vmatprep.subr.msk.bf16.mxu1 %vm192_vm0, %v1782_v10  ;;  %v158_v59 = vsub.s32 1, %v153_v55 }
  0x46   :  { %142 = vperm.xlu0 %1761, %v135_v2   ;;  %v2287_v13 = vld [vmem:[#allocation6 + $0x64] ss:$16 sps:$4 sm:$0xff]   ;;  %v194_v14 = vsel %vm192_vm0, %v1785_v11, 0  ;;  %v1788_v15 = vld [vmem:[%s2732_s1 + $0xc] ss:$16 sps:$4 sm:$0x3f]  }
  0x47   :  { %220 = vmatpush1.bf16.msra.mxu1 %v194_v14  ;;  %v2295_v16 = vld [vmem:[#allocation6 + $0x60] ss:$16 sps:$4 sm:$0xff]   ;;  %v2298_v17 = vld [vmem:[#allocation6 + $0x44] ss:$16 sps:$4 sm:$0xff]   ;;  %v2349_v36 = vld [vmem:[#allocation6 + $0xe8] ss:$16 sps:$4 sm:$0xff]  }
  0x48   :  { %457 = vmatpush1.bf16.msra.mxu0 %v2265_v6  ;;  %1648 = vmatprep.subr.msk.bf16.mxu1 %vm192_vm0, %v1788_v15  ;;  %v2300_v18 = vld [vmem:[#allocation6 + $0x40] ss:$16 sps:$4 sm:$0xff]   ;;  %v2302_v19 = vld [vmem:[#allocation6 + $0x24] ss:$16 sps:$4 sm:$0xff]   ;;  %v2351_v37 = vld [vmem:[#allocation6 + $0xcc] ss:$16 sps:$4 sm:$0xff]  }
  0x49   :  { %458 = vmatprep.subr.bf16.mxu0 %v2268_v7  ;;  %v2306_v20 = vld [vmem:[#allocation6 + $0x20] ss:$16 sps:$4 sm:$0xff]   ;;  %v2308_v21 = vld [vmem:[#allocation6 + $0x4] ss:$16 sps:$4 sm:$0xff]   ;;  %v2354_v38 = vld [vmem:[#allocation6 + $0xc8] ss:$16 sps:$4 sm:$0xff]  }
  0x4a   :  { %v2312_v22 = vld [vmem:[#allocation6] ss:$16 sps:$4 sm:$0xff]   ;;  %v1791_v28 = vld [vmem:[%s2732_s1 + $0x8] ss:$16 sps:$4 sm:$0x3f]   ;;  %v162_v11 = vsub.s32 2, %v153_v55 }
  0x4b   :  { %v291_v23 = vld [vmem:[#allocation9] sm:$0x3]  ;;  %v200_v34 = vsel %vm192_vm0, %v1791_v28, 0  ;;  %v2358_v39 = vld [vmem:[#allocation6 + $0xac] ss:$16 sps:$4 sm:$0xff]   ;;  %vm2172_vm4 = vmmov 0  }
  0x4c   :  { %459 = vmatpush1.bf16.msra.mxu0 %v2271_v8  ;;  %v2316_v24 = vpack.c.bf16 %v291_v23, %v291_v23  ;;  %v2361_v40 = vld [vmem:[#allocation6 + $0xa8] ss:$16 sps:$4 sm:$0xff]   ;;  %v2364_v41 = vld [vmem:[#allocation6 + $0x8c] ss:$16 sps:$4 sm:$0xff]   ;;  %v166_v23 = vsub.s32 3, %v153_v55 }
  0x4d   :  { %460 = vmatprep.subr.bf16.mxu0 %v2274_v9  ;;  %v2367_v42 = vld [vmem:[#allocation6 + $0x88] ss:$16 sps:$4 sm:$0xff]   ;;  %v2370_v43 = vld [vmem:[#allocation6 + $0x6c] ss:$16 sps:$4 sm:$0xff]  }
  0x4e   :  { %v2373_v44 = vld [vmem:[#allocation6 + $0x68] ss:$16 sps:$4 sm:$0xff]   ;;  %v2376_v45 = vld [vmem:[#allocation6 + $0x4c] ss:$16 sps:$4 sm:$0xff]  }
  0x4f   :  { %v2379_v46 = vld [vmem:[#allocation6 + $0x48] ss:$16 sps:$4 sm:$0xff]   ;;  %v2382_v47 = vld [vmem:[#allocation6 + $0x2c] ss:$16 sps:$4 sm:$0xff]  }
  0x50   :  { %461 = vmatpush1.bf16.msra.mxu0 %v2283_v12  ;;  %v2385_v48 = vld [vmem:[#allocation6 + $0x28] ss:$16 sps:$4 sm:$0xff]   ;;  %v2388_v49 = vld [vmem:[#allocation6 + $0xc] ss:$16 sps:$4 sm:$0xff]  }
  0x51   :  { %462 = vmatprep.subr.bf16.mxu0 %v2287_v13  ;;  %v2391_v50 = vld [vmem:[#allocation6 + $0x8] ss:$16 sps:$4 sm:$0xff]   ;;  %v101_v57 = vld [vmem:[#allocation3] sm:$0xf] }
  0x52   :  { %v155_v61 = vrot.slane %v101_v57, %v154_v56  ;;  %v159_v63 = vrot.slane %v101_v57, %v158_v59 }
  0x54   :  { %463 = vmatpush1.bf16.msra.mxu0 %v2295_v16 }
  0x55   :  { %464 = vmatprep.subr.bf16.mxu0 %v2298_v17 }
  0x58   :  { %465 = vmatpush1.bf16.msra.mxu0 %v2300_v18 }
  0x59   :  { %466 = vmatprep.subr.bf16.mxu0 %v2302_v19 }
  0x5c   :  { %467 = vmatpush1.bf16.msra.mxu0 %v2306_v20 }
  0x5d   :  { %468 = vmatprep.subr.bf16.mxu0 %v2308_v21 }
  0x60   :  { %469 = vmatpush1.bf16.msra.mxu0 %v2312_v22 }
  0x61   :  { %566 = vmatprep.subr.bf16.mxu0 %v2257_v3 }
  0x63   :  { %487 = vmatmul.mubr.bf16.vlgmr.msra.gmra.mxu0 %v2316_v24 }
  0x64   :  { %567 = vmatpush1.bf16.msra.mxu0 %v2259_v4  ;;  %598 = vmatprep.mubr.bf16.mxu0 %v2170_v0 }
  0x65   :  { %568 = vmatprep.subr.bf16.mxu0 %v2261_v5 }
  0x68   :  { %569 = vmatpush1.bf16.msra.mxu0 %v2265_v6 }
  0x69   :  { %570 = vmatprep.subr.bf16.mxu0 %v2268_v7 }
  0x6c   :  { %571 = vmatpush1.bf16.msra.mxu0 %v2271_v8 }
  0x6d   :  { %572 = vmatprep.subr.bf16.mxu0 %v2274_v9 }
  0x70   :  { %573 = vmatpush1.bf16.msra.mxu0 %v2283_v12 }
  0x71   :  { %574 = vmatprep.subr.bf16.mxu0 %v2287_v13 }
  0x74   :  { %575 = vmatpush1.bf16.msra.mxu0 %v2295_v16 }
  0x75   :  { %576 = vmatprep.subr.bf16.mxu0 %v2298_v17 }
  0x78   :  { %577 = vmatpush1.bf16.msra.mxu0 %v2300_v18 }
  0x79   :  { %578 = vmatprep.subr.bf16.mxu0 %v2302_v19 }
  0x7c   :  { %579 = vmatpush1.bf16.msra.mxu0 %v2306_v20 }
  0x7d   :  { %580 = vmatprep.subr.bf16.mxu0 %v2308_v21 }
  0x80   :  { %581 = vmatpush1.bf16.msra.mxu0 %v2312_v22 }
  0x81   :  { %696 = vmatprep.subr.bf16.mxu0 %v2257_v3 }
  0xbd   :  { %v140_v27 = vpop.permute.xlu0 %139 }
  0xbe   :  { %vm144_vm1 = vcmp.eq.s32.totalorder %v137_v26, %v140_v27 }
  0xbf   :  { %v1640_v31 = vsel %vm144_vm1, 1.0, %v2171_v30 }
  0xc1   :  { %v143_v29 = vpop.permute.xlu0 %142 }
  0xc2   :  { %vm145_vm2 = vcmp.eq.s32.totalorder %v137_v26, %v143_v29  ;;  %v163_v26 = vrot.slane %v101_v57, %v162_v11  ;;  %v167_v29 = vrot.slane %v101_v57, %v166_v23 }
  0xc3   :  { %v1641_v32 = vsel %vm145_vm2, 1.0, %v2171_v30 }
  0xc4   :  { %v150_v33 = vpack.c.bf16 %v1641_v32, %v1640_v31 }
  0xc6   :  { %1647 = vmatmul.mubr.msk.bf16.vlgmr.msra.gmra.mxu1 %vm188_vm3, %v150_v33 }
  0xc7   :  { %263 = vmatpush1.bf16.msra.mxu1 %v200_v34  ;;  %280 = vmatprep.mubr.bf16.mxu1 %v2170_v0 }
  0xc8   :  { %495 = vmatprep.subr.bf16.mxu1 %v2345_v35 }
  0xce   :  { %1649 = vmatmul.mubr.msk.bf16.vlgmr.msra.gmra.mxu1 %vm188_vm3, %v150_v33 }
  0xcf   :  { %496 = vmatpush1.bf16.msra.mxu1 %v2349_v36  ;;  %527 = vmatprep.mubr.bf16.mxu1 %v2170_v0 }
  0xd0   :  { %497 = vmatprep.subr.bf16.mxu1 %v2351_v37 }
  0xd3   :  { %498 = vmatpush1.bf16.msra.mxu1 %v2354_v38 }
  0xd4   :  { %499 = vmatprep.subr.bf16.mxu1 %v2358_v39 }
  0xd7   :  { %500 = vmatpush1.bf16.msra.mxu1 %v2361_v40 }
  0xd8   :  { %501 = vmatprep.subr.bf16.mxu1 %v2364_v41 }
  0xdb   :  { %502 = vmatpush1.bf16.msra.mxu1 %v2367_v42 }
  0xdc   :  { %503 = vmatprep.subr.bf16.mxu1 %v2370_v43 }
  0xdf   :  { %504 = vmatpush1.bf16.msra.mxu1 %v2373_v44 }
  0xe0   :  { %505 = vmatprep.subr.bf16.mxu1 %v2376_v45 }
  0xe3   :  { %506 = vmatpush1.bf16.msra.mxu1 %v2379_v46 }
  0xe4   :  { %507 = vmatprep.subr.bf16.mxu1 %v2382_v47 }
  0xe7   :  { %508 = vmatpush1.bf16.msra.mxu1 %v2385_v48 }
  0xe8   :  { %509 = vmatprep.subr.bf16.mxu1 %v2388_v49 }
  0xeb   :  { %510 = vmatpush1.bf16.msra.mxu1 %v2391_v50 }
  0xec   :  { %607 = vmatprep.subr.bf16.mxu1 %v2345_v35 }
  0xee   :  { %528 = vmatmul.mubr.bf16.vlgmr.msra.gmra.mxu1 %v2316_v24 }
  0xef   :  { %608 = vmatpush1.bf16.msra.mxu1 %v2349_v36  ;;  %639 = vmatprep.mubr.bf16.mxu1 %v2170_v0 }
  0xf0   :  { %609 = vmatprep.subr.bf16.mxu1 %v2351_v37 }
  0xf3   :  { %610 = vmatpush1.bf16.msra.mxu1 %v2354_v38 }
  0xf4   :  { %611 = vmatprep.subr.bf16.mxu1 %v2358_v39 }
  0xf7   :  { %612 = vmatpush1.bf16.msra.mxu1 %v2361_v40 }
  0xf8   :  { %613 = vmatprep.subr.bf16.mxu1 %v2364_v41 }
  0xfb   :  { %614 = vmatpush1.bf16.msra.mxu1 %v2367_v42 }
  0xfc   :  { %615 = vmatprep.subr.bf16.mxu1 %v2370_v43 }
  0xff   :  { %616 = vmatpush1.bf16.msra.mxu1 %v2373_v44 }
 0x100   :  { %617 = vmatprep.subr.bf16.mxu1 %v2376_v45 }
 0x103   :  { %618 = vmatpush1.bf16.msra.mxu1 %v2379_v46 }
 0x104   :  { %619 = vmatprep.subr.bf16.mxu1 %v2382_v47 }
 0x107   :  { %620 = vmatpush1.bf16.msra.mxu1 %v2385_v48 }
 0x108   :  { %621 = vmatprep.subr.bf16.mxu1 %v2388_v49 }
 0x10b   :  { %622 = vmatpush1.bf16.msra.mxu1 %v2391_v50 }
 0x10c   :  { %737 = vmatprep.subr.bf16.mxu1 %v2345_v35 }
 0x123   :  { %v488_v51 = vpop.f32.mrf.mxu0 }
 0x125   :  { %v490_v52 = vpop.f32.mrf.mxu0 }
 0x127   :  { %v492_v53 = vpop.f32.mrf.mxu0 }
 0x129   :  { %v493_v54 = vpop.f32.mrf.mxu0 }
 0x186   :  { %v239_v58 = vpop.f32.mrf.mxu1 }
 0x187   :  { %v2421_v24 = vadd.f32 %v239_v58, %v155_v61 }
 0x188   :  { %v241_v60 = vpop.f32.mrf.mxu1 }
 0x189   :  { %v2419_v15 = vadd.f32 %v241_v60, %v159_v63  ;;  %v536_v32 = vadd.f32 %v488_v51, %v2421_v24 }
 0x18a   :  { %v243_v62 = vpop.f32.mrf.mxu1 }
 0x18b   :  { %v2415_v1 = vadd.f32 %v243_v62, %v155_v61  ;;  %v537_v28 = vadd.f32 %v490_v52, %v2419_v15  ;;  %v1682_v54 = vmul.f32 -1.442695, %v536_v32 }
 0x18c   :  { %v245_v2 = vpop.f32.mrf.mxu1 }
 0x18d   :  { %v2417_v10 = vadd.f32 %v245_v2, %v159_v63  ;;  %v1683_v53 = vmul.f32 -1.442695, %v537_v28 }
 0x18e   :  { %v282_v14 = vpop.f32.mrf.mxu1 }
 0x18f   :  { %1824 = vpow2.f32 %v1683_v53  ;;  %v2429_v60 = vadd.f32 %v282_v14, %v163_v26 }
 0x190   :  { %v284_v25 = vpop.f32.mrf.mxu1  ;;  %1826 = vpow2.f32 %v1682_v54 }
 0x191   :  { %v2431_v52 = vadd.f32 %v284_v25, %v167_v29 }
 0x192   :  { %v286_v27 = vpop.f32.mrf.mxu1 }
 0x193   :  { %v2424_v31 = vadd.f32 %v286_v27, %v163_v26  ;;  %v293_v27 = vld [vmem:[#allocation11] sm:$0x3] }
 0x194   :  { %v288_v33 = vpop.f32.mrf.mxu1 }
 0x195   :  { %v2427_v34 = vadd.f32 %v288_v33, %v167_v29 }
 0x19c   :  { %v1825_v55 = vpop.eup %1824 }
 0x19d   :  { %v1827_v56 = vpop.eup %1826  ;;  %v549_v58 = vadd.f32 1.0, %v1825_v55 }
 0x19e   :  { %v543_v59 = vadd.f32 1.0, %v1827_v56 }
 0x19f   :  { %1828 = vrcp.f32 %v549_v58 }
 0x1a0   :  { %1830 = vrcp.f32 %v543_v59 }
 0x1ac   :  { %v1829_v23 = vpop.eup %1828 }
 0x1ad   :  { %v1831_v28 = vpop.eup %1830  ;;  %v559_v26 = vmul.f32 %v1829_v23, %v293_v27 }
 0x1ae   :  { %v529_v61 = vpop.f32.mrf.mxu1 }
 0x1af   :  { %v538_v57 = vadd.f32 %v529_v61, %v2429_v60 }
 0x1b0   :  { %v531_v51 = vpop.f32.mrf.mxu1 }
 0x1b1   :  { %1832 = vtanh.f32 %v538_v57  ;;  %v539_v62 = vadd.f32 %v531_v51, %v2431_v52 }
 0x1b2   :  { %v533_v63 = vpop.f32.mrf.mxu1 }
 0x1b3   :  { %v1684_v2 = vmul.f32 -1.442695, %v539_v62 }
 0x1b4   :  { %v534_v11 = vpop.f32.mrf.mxu1 }
 0x1b5   :  { %1834 = vpow2.f32 %v1684_v2 }
 0x1be   :  { %v1833_v14 = vpop.eup %1832 }
 0x1bf   :  { %v560_v32 = vmul.f32 %v1833_v14, %v1831_v28 }
 0x1c1   :  { %v2435_v33 = vadd.f32 %v560_v32, %v559_v26 }
 0x1c2   :  { %v1835_v25 = vpop.eup %1834 }
 0x1c3   :  { %v556_v29 = vadd.f32 1.0, %v1835_v25  ;;  %1836 = vtanh.f32 %v2435_v33 }
 0x1c5   :  { %1838 = vrcp.f32 %v556_v29 }
 0x1d0   :  { %v1837_v53 = vpop.eup %1836 }
 0x1d2   :  { %v1839_v54 = vpop.eup %1838 }
 0x1d3   :  { %v563_v55 = vmul.f32 %v1839_v54, %v1837_v53 }
 0x1d5   :  { %564 = vst [vmem:[#allocation2] sm:$0x3] %v563_v55  ;;  %v565_v56 = vpack.c.bf16 %v563_v55, %v563_v55 }
 0x1d7   :  { %599 = vmatmul.mubr.bf16.vlgmr.msra.gmra.mxu0 %v565_v56  ;;  %640 = vmatmul.mubr.bf16.vlgmr.msra.gmra.mxu1 %v565_v56 }
 0x1d8   :  { %697 = vmatpush1.bf16.msra.mxu0 %v2259_v4  ;;  %738 = vmatpush1.bf16.msra.mxu1 %v2349_v36 }
 0x1d9   :  { %698 = vmatprep.subr.bf16.mxu0 %v2261_v5  ;;  %739 = vmatprep.subr.bf16.mxu1 %v2351_v37 }
 0x1da   :  { %728 = vmatprep.mubr.bf16.mxu0 %v2170_v0  ;;  %769 = vmatprep.mubr.bf16.mxu1 %v2170_v0 }
 0x1dc   :  { %699 = vmatpush1.bf16.msra.mxu0 %v2265_v6  ;;  %740 = vmatpush1.bf16.msra.mxu1 %v2354_v38 }
 0x1dd   :  { %700 = vmatprep.subr.bf16.mxu0 %v2268_v7  ;;  %741 = vmatprep.subr.bf16.mxu1 %v2358_v39 }
 0x1e0   :  { %701 = vmatpush1.bf16.msra.mxu0 %v2271_v8  ;;  %742 = vmatpush1.bf16.msra.mxu1 %v2361_v40 }
 0x1e1   :  { %702 = vmatprep.subr.bf16.mxu0 %v2274_v9  ;;  %743 = vmatprep.subr.bf16.mxu1 %v2364_v41 }
 0x1e4   :  { %703 = vmatpush1.bf16.msra.mxu0 %v2283_v12  ;;  %744 = vmatpush1.bf16.msra.mxu1 %v2367_v42 }
 0x1e5   :  { %704 = vmatprep.subr.bf16.mxu0 %v2287_v13  ;;  %745 = vmatprep.subr.bf16.mxu1 %v2370_v43 }
 0x1e8   :  { %705 = vmatpush1.bf16.msra.mxu0 %v2295_v16  ;;  %746 = vmatpush1.bf16.msra.mxu1 %v2373_v44 }
 0x1e9   :  { %706 = vmatprep.subr.bf16.mxu0 %v2298_v17  ;;  %747 = vmatprep.subr.bf16.mxu1 %v2376_v45 }
 0x1ec   :  { %707 = vmatpush1.bf16.msra.mxu0 %v2300_v18  ;;  %748 = vmatpush1.bf16.msra.mxu1 %v2379_v46 }
 0x1ed   :  { %708 = vmatprep.subr.bf16.mxu0 %v2302_v19  ;;  %749 = vmatprep.subr.bf16.mxu1 %v2382_v47 }
 0x1f0   :  { %709 = vmatpush1.bf16.msra.mxu0 %v2306_v20  ;;  %750 = vmatpush1.bf16.msra.mxu1 %v2385_v48 }
 0x1f1   :  { %710 = vmatprep.subr.bf16.mxu0 %v2308_v21  ;;  %751 = vmatprep.subr.bf16.mxu1 %v2388_v49 }
 0x1f4   :  { %711 = vmatpush1.bf16.msra.mxu0 %v2312_v22  ;;  %752 = vmatpush1.bf16.msra.mxu1 %v2391_v50 }
 0x1f5   :  { %826 = vmatprep.subr.bf16.mxu0 %v2257_v3  ;;  %867 = vmatprep.subr.bf16.mxu1 %v2345_v35 }
 0x297   :  { %v600_v58 = vpop.f32.mrf.mxu0  ;;  %v641_v59 = vpop.f32.mrf.mxu1 }
 0x298   :  { %v652_v61 = vrot.slane %v600_v58, 6  ;;  %v654_v29 = vrot.slane %v641_v59, 6 }
 0x299   :  { %v602_v57 = vpop.f32.mrf.mxu0  ;;  %v643_v51 = vpop.f32.mrf.mxu1 }
 0x29a   :  { %v660_v62 = vadd.f32 %v652_v61, %v2421_v24  ;;  %v653_v63 = vrot.slane %v602_v57, 6  ;;  %v655_v32 = vrot.slane %v643_v51, 6  ;;  %v662_v55 = vadd.f32 %v654_v29, %v2429_v60 }
 0x29b   :  { %v604_v2 = vpop.f32.mrf.mxu0  ;;  %v645_v11 = vpop.f32.mrf.mxu1 }
 0x29c   :  { %v1685_v23 = vmul.f32 -1.442695, %v660_v62  ;;  %v661_v27 = vadd.f32 %v653_v63, %v2419_v15  ;;  %v663_v25 = vadd.f32 %v655_v32, %v2431_v52  ;;  %v684_v2 = vrot.slane %v2435_v33, 6 }
 0x29d   :  { %v605_v28 = vpop.f32.mrf.mxu0  ;;  %v646_v14 = vpop.f32.mrf.mxu1 }
 0x29e   :  { %1840 = vpow2.f32 %v1685_v23  ;;  %v1686_v26 = vmul.f32 -1.442695, %v661_v27  ;;  %v1687_v53 = vmul.f32 -1.442695, %v663_v25 }
 0x2a0   :  { %1842 = vpow2.f32 %v1686_v26 }
 0x2a1   :  { %1844 = vpow2.f32 %v1687_v53 }
 0x2ab   :  { %v1841_v54 = vpop.eup %1840 }
 0x2ac   :  { %v667_v56 = vadd.f32 1.0, %v1841_v54 }
 0x2ad   :  { %v1843_v58 = vpop.eup %1842 }
 0x2ae   :  { %1846 = vrcp.f32 %v667_v56  ;;  %v673_v61 = vadd.f32 1.0, %v1843_v58  ;;  %v1845_v57 = vpop.eup %1844 }
 0x2af   :  { %1848 = vtanh.f32 %v662_v55  ;;  %v680_v11 = vadd.f32 1.0, %v1845_v57 }
 0x2b0   :  { %1850 = vrcp.f32 %v673_v61 }
 0x2b1   :  { %1852 = vrcp.f32 %v680_v11 }
 0x2bb   :  { %v1847_v62 = vpop.eup %1846 }
 0x2bc   :  { %v1849_v63 = vpop.eup %1848 }
 0x2bd   :  { %v1851_v51 = vpop.eup %1850  ;;  %v687_v23 = vmul.f32 %v1849_v63, %v1847_v62 }
 0x2be   :  { %v686_v59 = vmul.f32 %v1851_v51, %v684_v2  ;;  %v1853_v28 = vpop.eup %1852 }
 0x2c0   :  { %v2477_v27 = vadd.f32 %v687_v23, %v686_v59 }
 0x2c2   :  { %1854 = vtanh.f32 %v2477_v27 }
 0x2cf   :  { %v1855_v14 = vpop.eup %1854 }
 0x2d0   :  { %v690_v26 = vmul.f32 %v1855_v14, %v1853_v28 }
 0x2d2   :  { %691 = vst [vmem:[#allocation2] sm:$0xc] %v690_v26  ;;  %v692_v32 = vpack.c.bf16 %v690_v26, %v690_v26 }
 0x2d4   :  { %v694_v25 = vrot.slane %v692_v32, 1 }
 0x2d6   :  { %729 = vmatmul.mubr.bf16.vlgmr.msra.gmra.mxu0 %v694_v25  ;;  %770 = vmatmul.mubr.bf16.vlgmr.msra.gmra.mxu1 %v694_v25 }
 0x2d7   :  { %827 = vmatpush1.bf16.msra.mxu0 %v2259_v4  ;;  %868 = vmatpush1.bf16.msra.mxu1 %v2349_v36 }
 0x2d8   :  { %828 = vmatprep.subr.bf16.mxu0 %v2261_v5  ;;  %869 = vmatprep.subr.bf16.mxu1 %v2351_v37 }
 0x2d9   :  { %858 = vmatprep.mubr.bf16.mxu0 %v2170_v0  ;;  %899 = vmatprep.mubr.bf16.mxu1 %v2170_v0 }
 0x2db   :  { %829 = vmatpush1.bf16.msra.mxu0 %v2265_v6  ;;  %870 = vmatpush1.bf16.msra.mxu1 %v2354_v38 }
 0x2dc   :  { %830 = vmatprep.subr.bf16.mxu0 %v2268_v7  ;;  %871 = vmatprep.subr.bf16.mxu1 %v2358_v39 }
 0x2df   :  { %831 = vmatpush1.bf16.msra.mxu0 %v2271_v8  ;;  %872 = vmatpush1.bf16.msra.mxu1 %v2361_v40 }
 0x2e0   :  { %832 = vmatprep.subr.bf16.mxu0 %v2274_v9  ;;  %873 = vmatprep.subr.bf16.mxu1 %v2364_v41 }
 0x2e3   :  { %833 = vmatpush1.bf16.msra.mxu0 %v2283_v12  ;;  %874 = vmatpush1.bf16.msra.mxu1 %v2367_v42 }
 0x2e4   :  { %834 = vmatprep.subr.bf16.mxu0 %v2287_v13  ;;  %875 = vmatprep.subr.bf16.mxu1 %v2370_v43 }
 0x2e7   :  { %835 = vmatpush1.bf16.msra.mxu0 %v2295_v16  ;;  %876 = vmatpush1.bf16.msra.mxu1 %v2373_v44 }
 0x2e8   :  { %836 = vmatprep.subr.bf16.mxu0 %v2298_v17  ;;  %877 = vmatprep.subr.bf16.mxu1 %v2376_v45 }
 0x2eb   :  { %837 = vmatpush1.bf16.msra.mxu0 %v2300_v18  ;;  %878 = vmatpush1.bf16.msra.mxu1 %v2379_v46 }
 0x2ec   :  { %838 = vmatprep.subr.bf16.mxu0 %v2302_v19  ;;  %879 = vmatprep.subr.bf16.mxu1 %v2382_v47 }
 0x2ef   :  { %839 = vmatpush1.bf16.msra.mxu0 %v2306_v20  ;;  %880 = vmatpush1.bf16.msra.mxu1 %v2385_v48 }
 0x2f0   :  { %840 = vmatprep.subr.bf16.mxu0 %v2308_v21  ;;  %881 = vmatprep.subr.bf16.mxu1 %v2388_v49 }
 0x2f3   :  { %841 = vmatpush1.bf16.msra.mxu0 %v2312_v22  ;;  %882 = vmatpush1.bf16.msra.mxu1 %v2391_v50 }
 0x2f4   :  { %956 = vmatprep.subr.bf16.mxu0 %v2257_v3  ;;  %997 = vmatprep.subr.bf16.mxu1 %v2345_v35 }
 0x396   :  { %v730_v33 = vpop.f32.mrf.mxu0  ;;  %v771_v29 = vpop.f32.mrf.mxu1 }
 0x397   :  { %v782_v53 = vrot.slane %v730_v33, 4  ;;  %v784_v28 = vrot.slane %v771_v29, 4 }
 0x398   :  { %v732_v54 = vpop.f32.mrf.mxu0  ;;  %v773_v55 = vpop.f32.mrf.mxu1 }
 0x399   :  { %v790_v56 = vadd.f32 %v782_v53, %v2421_v24  ;;  %v783_v58 = vrot.slane %v732_v54, 4  ;;  %v785_v23 = vrot.slane %v773_v55, 4  ;;  %v792_v32 = vadd.f32 %v784_v28, %v2429_v60 }
 0x39a   :  { %v734_v61 = vpop.f32.mrf.mxu0  ;;  %v775_v57 = vpop.f32.mrf.mxu1 }
 0x39b   :  { %v1688_v62 = vmul.f32 -1.442695, %v790_v56  ;;  %v791_v63 = vadd.f32 %v783_v58, %v2419_v15  ;;  %v793_v59 = vadd.f32 %v785_v23, %v2431_v52  ;;  %v814_v61 = vrot.slane %v2477_v27, 6 }
 0x39c   :  { %v735_v2 = vpop.f32.mrf.mxu0  ;;  %v776_v51 = vpop.f32.mrf.mxu1 }
 0x39d   :  { %1856 = vpow2.f32 %v1688_v62  ;;  %v1689_v11 = vmul.f32 -1.442695, %v791_v63  ;;  %v1690_v14 = vmul.f32 -1.442695, %v793_v59 }
 0x39f   :  { %1858 = vpow2.f32 %v1689_v11 }
 0x3a0   :  { %1860 = vpow2.f32 %v1690_v14 }
 0x3aa   :  { %v1857_v26 = vpop.eup %1856 }
 0x3ab   :  { %v797_v25 = vadd.f32 1.0, %v1857_v26 }
 0x3ac   :  { %v1859_v33 = vpop.eup %1858 }
 0x3ad   :  { %1862 = vrcp.f32 %v797_v25  ;;  %v803_v53 = vadd.f32 1.0, %v1859_v33  ;;  %v1861_v54 = vpop.eup %1860 }
 0x3ae   :  { %1864 = vtanh.f32 %v792_v32  ;;  %v810_v57 = vadd.f32 1.0, %v1861_v54 }
 0x3af   :  { %1866 = vrcp.f32 %v803_v53 }
 0x3b0   :  { %1868 = vrcp.f32 %v810_v57 }
 0x3ba   :  { %v1863_v56 = vpop.eup %1862 }
 0x3bb   :  { %v1865_v58 = vpop.eup %1864 }
 0x3bc   :  { %v1867_v55 = vpop.eup %1866  ;;  %v817_v62 = vmul.f32 %v1865_v58, %v1863_v56 }
 0x3bd   :  { %v816_v29 = vmul.f32 %v1867_v55, %v814_v61  ;;  %v1869_v2 = vpop.eup %1868 }
 0x3bf   :  { %v2519_v63 = vadd.f32 %v817_v62, %v816_v29 }
 0x3c1   :  { %1870 = vtanh.f32 %v2519_v63 }
 0x3ce   :  { %v1871_v51 = vpop.eup %1870 }
 0x3cf   :  { %v820_v11 = vmul.f32 %v1871_v51, %v1869_v2 }
 0x3d1   :  { %821 = vst [vmem:[#allocation2] sm:$0x30] %v820_v11  ;;  %v822_v23 = vpack.c.bf16 %v820_v11, %v820_v11 }
 0x3d3   :  { %v824_v59 = vrot.slane %v822_v23, 2 }
 0x3d5   :  { %859 = vmatmul.mubr.bf16.vlgmr.msra.gmra.mxu0 %v824_v59  ;;  %900 = vmatmul.mubr.bf16.vlgmr.msra.gmra.mxu1 %v824_v59 }
 0x3d6   :  { %957 = vmatpush1.bf16.msra.mxu0 %v2259_v4  ;;  %998 = vmatpush1.bf16.msra.mxu1 %v2349_v36 }
 0x3d7   :  { %958 = vmatprep.subr.bf16.mxu0 %v2261_v5  ;;  %999 = vmatprep.subr.bf16.mxu1 %v2351_v37 }
 0x3d8   :  { %988 = vmatprep.mubr.bf16.mxu0 %v2170_v0  ;;  %1029 = vmatprep.mubr.bf16.mxu1 %v2170_v0 }
 0x3da   :  { %959 = vmatpush1.bf16.msra.mxu0 %v2265_v6  ;;  %1000 = vmatpush1.bf16.msra.mxu1 %v2354_v38 }
 0x3db   :  { %960 = vmatprep.subr.bf16.mxu0 %v2268_v7  ;;  %1001 = vmatprep.subr.bf16.mxu1 %v2358_v39 }
 0x3de   :  { %961 = vmatpush1.bf16.msra.mxu0 %v2271_v8  ;;  %1002 = vmatpush1.bf16.msra.mxu1 %v2361_v40 }
 0x3df   :  { %962 = vmatprep.subr.bf16.mxu0 %v2274_v9  ;;  %1003 = vmatprep.subr.bf16.mxu1 %v2364_v41 }
 0x3e2   :  { %963 = vmatpush1.bf16.msra.mxu0 %v2283_v12  ;;  %1004 = vmatpush1.bf16.msra.mxu1 %v2367_v42 }
 0x3e3   :  { %964 = vmatprep.subr.bf16.mxu0 %v2287_v13  ;;  %1005 = vmatprep.subr.bf16.mxu1 %v2370_v43 }
 0x3e6   :  { %965 = vmatpush1.bf16.msra.mxu0 %v2295_v16  ;;  %1006 = vmatpush1.bf16.msra.mxu1 %v2373_v44 }
 0x3e7   :  { %966 = vmatprep.subr.bf16.mxu0 %v2298_v17  ;;  %1007 = vmatprep.subr.bf16.mxu1 %v2376_v45 }
 0x3ea   :  { %967 = vmatpush1.bf16.msra.mxu0 %v2300_v18  ;;  %1008 = vmatpush1.bf16.msra.mxu1 %v2379_v46 }
 0x3eb   :  { %968 = vmatprep.subr.bf16.mxu0 %v2302_v19  ;;  %1009 = vmatprep.subr.bf16.mxu1 %v2382_v47 }
 0x3ee   :  { %969 = vmatpush1.bf16.msra.mxu0 %v2306_v20  ;;  %1010 = vmatpush1.bf16.msra.mxu1 %v2385_v48 }
 0x3ef   :  { %970 = vmatprep.subr.bf16.mxu0 %v2308_v21  ;;  %1011 = vmatprep.subr.bf16.mxu1 %v2388_v49 }
 0x3f2   :  { %971 = vmatpush1.bf16.msra.mxu0 %v2312_v22  ;;  %1012 = vmatpush1.bf16.msra.mxu1 %v2391_v50 }
 0x3f3   :  { %1071 = vmatprep.subr.bf16.mxu0 %v2257_v3  ;;  %1112 = vmatprep.subr.bf16.mxu1 %v2345_v35 }
 0x495   :  { %v860_v27 = vpop.f32.mrf.mxu0  ;;  %v901_v28 = vpop.f32.mrf.mxu1 }
 0x496   :  { %v912_v14 = vrot.slane %v860_v27, 2  ;;  %v914_v29 = vrot.slane %v901_v28, 2 }
 0x497   :  { %v862_v26 = vpop.f32.mrf.mxu0  ;;  %v903_v32 = vpop.f32.mrf.mxu1 }
 0x498   :  { %v920_v25 = vadd.f32 %v912_v14, %v2421_v24  ;;  %v913_v33 = vrot.slane %v862_v26, 2  ;;  %v915_v3 = vrot.slane %v903_v32, 2  ;;  %v922_v11 = vadd.f32 %v914_v29, %v2429_v60 }
 0x499   :  { %v864_v53 = vpop.f32.mrf.mxu0  ;;  %v905_v54 = vpop.f32.mrf.mxu1  ;;  %v944_v26 = vrot.slane %v2519_v63, 6 }
 0x49a   :  { %v1691_v56 = vmul.f32 -1.442695, %v920_v25  ;;  %v921_v58 = vadd.f32 %v913_v33, %v2419_v15  ;;  %v923_v62 = vadd.f32 %v915_v3, %v2431_v52 }
 0x49b   :  { %v865_v61 = vpop.f32.mrf.mxu0  ;;  %v906_v55 = vpop.f32.mrf.mxu1 }
 0x49c   :  { %1872 = vpow2.f32 %v1691_v56  ;;  %v1692_v57 = vmul.f32 -1.442695, %v921_v58  ;;  %v1693_v2 = vmul.f32 -1.442695, %v923_v62 }
 0x49e   :  { %1874 = vpow2.f32 %v1692_v57 }
 0x49f   :  { %1876 = vpow2.f32 %v1693_v2 }
 0x4a9   :  { %v1873_v51 = vpop.eup %1872 }
 0x4aa   :  { %v927_v24 = vadd.f32 1.0, %v1873_v51 }
 0x4ab   :  { %v1875_v23 = vpop.eup %1874 }
 0x4ac   :  { %1878 = vrcp.f32 %v927_v24  ;;  %v933_v59 = vadd.f32 1.0, %v1875_v23  ;;  %v1877_v15 = vpop.eup %1876 }
 0x4ad   :  { %1880 = vtanh.f32 %v922_v11  ;;  %v940_v25 = vadd.f32 1.0, %v1877_v15 }
 0x4ae   :  { %1882 = vrcp.f32 %v933_v59 }
 0x4af   :  { %1884 = vrcp.f32 %v940_v25  ;;  %v2608_v25 = vld [vmem:[#allocation6 + $0xe0] ss:$16 sps:$4 sm:$0xff]  }
 0x4b9   :  { %v1879_v27 = vpop.eup %1878 }
 0x4ba   :  { %v1881_v14 = vpop.eup %1880 }
 0x4bb   :  { %v1883_v32 = vpop.eup %1882  ;;  %v947_v52 = vmul.f32 %v1881_v14, %v1879_v27 }
 0x4bc   :  { %v946_v28 = vmul.f32 %v1883_v32, %v944_v26  ;;  %v1885_v60 = vpop.eup %1884 }
 0x4be   :  { %v2561_v33 = vadd.f32 %v947_v52, %v946_v28  ;;  %v2612_v52 = vld [vmem:[#allocation6 + $0xc4] ss:$16 sps:$4 sm:$0xff]   ;;  %v2618_v28 = vld [vmem:[#allocation6 + $0xc0] ss:$16 sps:$4 sm:$0xff]  }
 0x4c0   :  { %1886 = vtanh.f32 %v2561_v33  ;;  %v1062_v51 = vrot.slane %v2561_v33, 6  ;;  %v2622_v33 = vld [vmem:[#allocation6 + $0xa4] ss:$16 sps:$4 sm:$0xff]  }
 0x4cd   :  { %v1887_v53 = vpop.eup %1886 }
 0x4ce   :  { %v950_v54 = vmul.f32 %v1887_v53, %v1885_v60  ;;  %v2634_v60 = vld [vmem:[#allocation6 + $0x80] ss:$16 sps:$4 sm:$0xff]  }
 0x4d0   :  { %951 = vst [vmem:[#allocation2] sm:$0xc0] %v950_v54  ;;  %v952_v56 = vpack.c.bf16 %v950_v54, %v950_v54 }
 0x4d2   :  { %v954_v58 = vrot.slane %v952_v56, 3 }
 0x4d4   :  { %989 = vmatmul.mubr.bf16.vlgmr.msra.gmra.mxu0 %v954_v58  ;;  %1030 = vmatmul.mubr.bf16.vlgmr.msra.gmra.mxu1 %v954_v58 }
 0x4d5   :  { %1072 = vmatpush1.bf16.msra.mxu0 %v2259_v4  ;;  %1113 = vmatpush1.bf16.msra.mxu1 %v2349_v36  ;;  %v2596_v4 = vld [vmem:[#allocation6 + $0xe4] ss:$16 sps:$4 sm:$0xff]  }
 0x4d6   :  { %1073 = vmatprep.subr.bf16.mxu0 %v2261_v5  ;;  %1114 = vmatprep.subr.bf16.mxu1 %v2351_v37 }
 0x4d7   :  { %1103 = vmatprep.mubr.bf16.mxu0 %v2170_v0  ;;  %1144 = vmatprep.mubr.bf16.mxu1 %v2170_v0 }
 0x4d9   :  { %1074 = vmatpush1.bf16.msra.mxu0 %v2265_v6  ;;  %1115 = vmatpush1.bf16.msra.mxu1 %v2354_v38 }
 0x4da   :  { %1075 = vmatprep.subr.bf16.mxu0 %v2268_v7  ;;  %1116 = vmatprep.subr.bf16.mxu1 %v2358_v39 }
 0x4dd   :  { %1076 = vmatpush1.bf16.msra.mxu0 %v2271_v8  ;;  %1117 = vmatpush1.bf16.msra.mxu1 %v2361_v40 }
 0x4de   :  { %1077 = vmatprep.subr.bf16.mxu0 %v2274_v9  ;;  %1118 = vmatprep.subr.bf16.mxu1 %v2364_v41 }
 0x4e1   :  { %1078 = vmatpush1.bf16.msra.mxu0 %v2283_v12  ;;  %1119 = vmatpush1.bf16.msra.mxu1 %v2367_v42 }
 0x4e2   :  { %1079 = vmatprep.subr.bf16.mxu0 %v2287_v13  ;;  %1120 = vmatprep.subr.bf16.mxu1 %v2370_v43 }
 0x4e5   :  { %1080 = vmatpush1.bf16.msra.mxu0 %v2295_v16  ;;  %1121 = vmatpush1.bf16.msra.mxu1 %v2373_v44 }
 0x4e6   :  { %1081 = vmatprep.subr.bf16.mxu0 %v2298_v17  ;;  %1122 = vmatprep.subr.bf16.mxu1 %v2376_v45 }
 0x4e9   :  { %1082 = vmatpush1.bf16.msra.mxu0 %v2300_v18  ;;  %1123 = vmatpush1.bf16.msra.mxu1 %v2379_v46 }
 0x4ea   :  { %1083 = vmatprep.subr.bf16.mxu0 %v2302_v19  ;;  %1124 = vmatprep.subr.bf16.mxu1 %v2382_v47 }
 0x4ed   :  { %1084 = vmatpush1.bf16.msra.mxu0 %v2306_v20  ;;  %1125 = vmatpush1.bf16.msra.mxu1 %v2385_v48 }
 0x4ee   :  { %1085 = vmatprep.subr.bf16.mxu0 %v2308_v21  ;;  %1126 = vmatprep.subr.bf16.mxu1 %v2388_v49 }
 0x4f1   :  { %1086 = vmatpush1.bf16.msra.mxu0 %v2312_v22  ;;  %1127 = vmatpush1.bf16.msra.mxu1 %v2391_v50 }
 0x4f2   :  { %1201 = vmatprep.subr.bf16.mxu0 %v2596_v4  ;;  %1242 = vmatprep.subr.bf16.mxu1 %v2345_v35 }
 0x594   :  { %v990_v5 = vpop.f32.mrf.mxu0  ;;  %v1031_v6 = vpop.f32.mrf.mxu1 }
 0x595   :  { %v1038_v7 = vadd.f32 %v990_v5, %v2415_v1  ;;  %v1040_v61 = vadd.f32 %v1031_v6, %v2424_v31 }
 0x596   :  { %v992_v8 = vpop.f32.mrf.mxu0  ;;  %v1033_v9 = vpop.f32.mrf.mxu1 }
 0x597   :  { %v1694_v12 = vmul.f32 -1.442695, %v1038_v7  ;;  %v1039_v13 = vadd.f32 %v992_v8, %v2417_v10  ;;  %v1041_v21 = vadd.f32 %v1033_v9, %v2427_v34 }
 0x598   :  { %v994_v16 = vpop.f32.mrf.mxu0  ;;  %v1035_v17 = vpop.f32.mrf.mxu1 }
 0x599   :  { %1888 = vpow2.f32 %v1694_v12  ;;  %v1695_v18 = vmul.f32 -1.442695, %v1039_v13  ;;  %v1696_v22 = vmul.f32 -1.442695, %v1041_v21 }
 0x59a   :  { %v995_v19 = vpop.f32.mrf.mxu0  ;;  %v1036_v20 = vpop.f32.mrf.mxu1 }
 0x59b   :  { %1890 = vpow2.f32 %v1695_v18 }
 0x59c   :  { %1892 = vpow2.f32 %v1696_v22 }
 0x5a6   :  { %v1889_v63 = vpop.eup %1888 }
 0x5a7   :  { %v1045_v55 = vadd.f32 1.0, %v1889_v63 }
 0x5a8   :  { %v1891_v57 = vpop.eup %1890 }
 0x5a9   :  { %1894 = vrcp.f32 %v1045_v55  ;;  %v1051_v3 = vadd.f32 1.0, %v1891_v57  ;;  %v1893_v62 = vpop.eup %1892 }
 0x5aa   :  { %1896 = vtanh.f32 %v1040_v61  ;;  %v1058_v24 = vadd.f32 1.0, %v1893_v62 }
 0x5ab   :  { %1898 = vrcp.f32 %v1051_v3 }
 0x5ac   :  { %1900 = vrcp.f32 %v1058_v24 }
 0x5b6   :  { %v1895_v29 = vpop.eup %1894 }
 0x5b7   :  { %v1897_v2 = vpop.eup %1896 }
 0x5b8   :  { %v1899_v11 = vpop.eup %1898  ;;  %v1065_v23 = vmul.f32 %v1897_v2, %v1895_v29 }
 0x5b9   :  { %v1064_v59 = vmul.f32 %v1899_v11, %v1062_v51  ;;  %v1901_v27 = vpop.eup %1900 }
 0x5bb   :  { %v2605_v15 = vadd.f32 %v1065_v23, %v1064_v59  ;;  %v1976_v59 = vld [vmem:[#allocation6 + $0xe8] ss:$16 sps:$4 sm:$0xff]  }
 0x5bd   :  { %1902 = vtanh.f32 %v2605_v15  ;;  %v1189_v61 = vrot.slane %v2605_v15, 6  ;;  %v1977_v15 = vld [vmem:[#allocation6 + $0xcc] ss:$16 sps:$4 sm:$0xff]  }
 0x5ca   :  { %v1903_v14 = vpop.eup %1902 }
 0x5cb   :  { %v1068_v26 = vmul.f32 %v1903_v14, %v1901_v27  ;;  %v1978_v27 = vld [vmem:[#allocation6 + $0xc8] ss:$16 sps:$4 sm:$0xff]   ;;  %v1979_v14 = vld [vmem:[#allocation6 + $0xac] ss:$16 sps:$4 sm:$0xff]  }
 0x5cd   :  { %1069 = vst [vmem:[#allocation2 + $0x8] sm:$0x3] %v1068_v26  ;;  %v1070_v32 = vpack.c.bf16 %v1068_v26, %v1068_v26  ;;  %v1980_v26 = vld [vmem:[#allocation6 + $0xa8] ss:$16 sps:$4 sm:$0xff]  }
 0x5cf   :  { %1104 = vmatmul.mubr.bf16.vlgmr.msra.gmra.mxu0 %v1070_v32  ;;  %1145 = vmatmul.mubr.bf16.vlgmr.msra.gmra.mxu1 %v1070_v32  ;;  %v1981_v32 = vld [vmem:[#allocation6 + $0x8c] ss:$16 sps:$4 sm:$0xff]  }
 0x5d0   :  { %1202 = vmatpush1.bf16.msra.mxu0 %v2608_v25  ;;  %1243 = vmatpush1.bf16.msra.mxu1 %v2349_v36  ;;  %v2626_v36 = vld [vmem:[#allocation6 + $0xa0] ss:$16 sps:$4 sm:$0xff]  }
 0x5d1   :  { %1203 = vmatprep.subr.bf16.mxu0 %v2612_v52  ;;  %1244 = vmatprep.subr.bf16.mxu1 %v2351_v37  ;;  %v2630_v37 = vld [vmem:[#allocation6 + $0x84] ss:$16 sps:$4 sm:$0xff]  }
 0x5d2   :  { %1233 = vmatprep.mubr.bf16.mxu0 %v2170_v0  ;;  %1274 = vmatprep.mubr.bf16.mxu1 %v2170_v0 }
 0x5d4   :  { %1204 = vmatpush1.bf16.msra.mxu0 %v2618_v28  ;;  %1245 = vmatpush1.bf16.msra.mxu1 %v2354_v38  ;;  %v2638_v38 = vld [vmem:[#allocation6 + $0x64] ss:$16 sps:$4 sm:$0xff]  }
 0x5d5   :  { %1205 = vmatprep.subr.bf16.mxu0 %v2622_v33  ;;  %1246 = vmatprep.subr.bf16.mxu1 %v2358_v39  ;;  %v2642_v39 = vld [vmem:[#allocation6 + $0x60] ss:$16 sps:$4 sm:$0xff]  }
 0x5d8   :  { %1206 = vmatpush1.bf16.msra.mxu0 %v2626_v36  ;;  %1247 = vmatpush1.bf16.msra.mxu1 %v2361_v40  ;;  %v2646_v40 = vld [vmem:[#allocation6 + $0x44] ss:$16 sps:$4 sm:$0xff]  }
 0x5d9   :  { %1207 = vmatprep.subr.bf16.mxu0 %v2630_v37  ;;  %1248 = vmatprep.subr.bf16.mxu1 %v2364_v41  ;;  %v2650_v41 = vld [vmem:[#allocation6 + $0x40] ss:$16 sps:$4 sm:$0xff]  }
 0x5dc   :  { %1208 = vmatpush1.bf16.msra.mxu0 %v2634_v60  ;;  %1249 = vmatpush1.bf16.msra.mxu1 %v2367_v42  ;;  %v2654_v42 = vld [vmem:[#allocation6 + $0x24] ss:$16 sps:$4 sm:$0xff]  }
 0x5dd   :  { %1209 = vmatprep.subr.bf16.mxu0 %v2638_v38  ;;  %1250 = vmatprep.subr.bf16.mxu1 %v2370_v43  ;;  %v2658_v43 = vld [vmem:[#allocation6 + $0x20] ss:$16 sps:$4 sm:$0xff]  }
 0x5e0   :  { %1210 = vmatpush1.bf16.msra.mxu0 %v2642_v39  ;;  %1251 = vmatpush1.bf16.msra.mxu1 %v2373_v44  ;;  %v2662_v44 = vld [vmem:[#allocation6 + $0x4] ss:$16 sps:$4 sm:$0xff]  }
 0x5e1   :  { %1211 = vmatprep.subr.bf16.mxu0 %v2646_v40  ;;  %1252 = vmatprep.subr.bf16.mxu1 %v2376_v45  ;;  %v2666_v45 = vld [vmem:[#allocation6] ss:$16 sps:$4 sm:$0xff]  }
 0x5e4   :  { %1212 = vmatpush1.bf16.msra.mxu0 %v2650_v41  ;;  %1253 = vmatpush1.bf16.msra.mxu1 %v2379_v46 }
 0x5e5   :  { %1213 = vmatprep.subr.bf16.mxu0 %v2654_v42  ;;  %1254 = vmatprep.subr.bf16.mxu1 %v2382_v47 }
 0x5e8   :  { %1214 = vmatpush1.bf16.msra.mxu0 %v2658_v43  ;;  %1255 = vmatpush1.bf16.msra.mxu1 %v2385_v48 }
 0x5e9   :  { %1215 = vmatprep.subr.bf16.mxu0 %v2662_v44  ;;  %1256 = vmatprep.subr.bf16.mxu1 %v2388_v49 }
 0x5ec   :  { %1216 = vmatpush1.bf16.msra.mxu0 %v2666_v45  ;;  %1257 = vmatpush1.bf16.msra.mxu1 %v2391_v50 }
 0x5ed   :  { %1331 = vmatprep.subr.bf16.mxu0 %v2596_v4  ;;  %1372 = vmatprep.subr.bf16.mxu1 %v2345_v35 }
 0x68f   :  { %v1105_v46 = vpop.f32.mrf.mxu0  ;;  %v1146_v47 = vpop.f32.mrf.mxu1 }
 0x690   :  { %v1157_v53 = vrot.slane %v1105_v46, 6  ;;  %v1159_v12 = vrot.slane %v1146_v47, 6 }
 0x691   :  { %v1107_v48 = vpop.f32.mrf.mxu0  ;;  %v1148_v54 = vpop.f32.mrf.mxu1 }
 0x692   :  { %v1165_v56 = vadd.f32 %v1157_v53, %v2415_v1  ;;  %v1158_v58 = vrot.slane %v1107_v48, 6  ;;  %v1160_v4 = vrot.slane %v1148_v54, 6  ;;  %v1167_v17 = vadd.f32 %v1159_v12, %v2424_v31 }
 0x693   :  { %v1109_v5 = vpop.f32.mrf.mxu0  ;;  %v1150_v49 = vpop.f32.mrf.mxu1 }
 0x694   :  { %v1697_v6 = vmul.f32 -1.442695, %v1165_v56  ;;  %v1166_v7 = vadd.f32 %v1158_v58, %v2417_v10  ;;  %v1168_v35 = vadd.f32 %v1160_v4, %v2427_v34 }
 0x695   :  { %v1110_v8 = vpop.f32.mrf.mxu0  ;;  %v1151_v9 = vpop.f32.mrf.mxu1 }
 0x696   :  { %1904 = vpow2.f32 %v1697_v6  ;;  %v1698_v50 = vmul.f32 -1.442695, %v1166_v7  ;;  %v1699_v13 = vmul.f32 -1.442695, %v1168_v35 }
 0x698   :  { %1906 = vpow2.f32 %v1698_v50 }
 0x699   :  { %1908 = vpow2.f32 %v1699_v13 }
 0x6a3   :  { %v1905_v16 = vpop.eup %1904 }
 0x6a4   :  { %v1172_v18 = vadd.f32 1.0, %v1905_v16 }
 0x6a5   :  { %v1907_v19 = vpop.eup %1906 }
 0x6a6   :  { %1910 = vrcp.f32 %v1172_v18  ;;  %v1178_v20 = vadd.f32 1.0, %v1907_v19  ;;  %v1909_v21 = vpop.eup %1908 }
 0x6a7   :  { %1912 = vtanh.f32 %v1167_v17  ;;  %v1185_v57 = vadd.f32 1.0, %v1909_v21 }
 0x6a8   :  { %1914 = vrcp.f32 %v1178_v20 }
 0x6a9   :  { %1916 = vrcp.f32 %v1185_v57 }
 0x6b3   :  { %v1911_v22 = vpop.eup %1910 }
 0x6b4   :  { %v1913_v63 = vpop.eup %1912 }
 0x6b5   :  { %v1915_v55 = vpop.eup %1914  ;;  %v1192_v3 = vmul.f32 %v1913_v63, %v1911_v22 }
 0x6b6   :  { %v1191_v62 = vmul.f32 %v1915_v55, %v1189_v61  ;;  %v1917_v2 = vpop.eup %1916 }
 0x6b8   :  { %v2677_v29 = vadd.f32 %v1192_v3, %v1191_v62  ;;  %v1816_v62 = vld [vmem:[#allocation8 + $0x38] sm:$0xff]  }
 0x6ba   :  { %1918 = vtanh.f32 %v2677_v29  ;;  %v1319_v17 = vrot.slane %v2677_v29, 6  ;;  %v1817_v29 = vld [vmem:[#allocation8 + $0x30] sm:$0xff]  }
 0x6c7   :  { %v1919_v51 = vpop.eup %1918 }
 0x6c8   :  { %v1195_v11 = vmul.f32 %v1919_v51, %v1917_v2  ;;  %v1818_v2 = vld [vmem:[#allocation8 + $0x28] sm:$0xff]   ;;  %v1819_v51 = vld [vmem:[#allocation8 + $0x20] sm:$0xff]  }
 0x6ca   :  { %1196 = vst [vmem:[#allocation2 + $0x8] sm:$0xc] %v1195_v11  ;;  %v1197_v24 = vpack.c.bf16 %v1195_v11, %v1195_v11  ;;  %v1820_v11 = vld [vmem:[#allocation8 + $0x18] sm:$0xff]  }
 0x6cc   :  { %v1199_v23 = vrot.slane %v1197_v24, 1  ;;  %v1821_v24 = vld [vmem:[#allocation8 + $0x10] sm:$0xff]  }
 0x6ce   :  { %1234 = vmatmul.mubr.bf16.vlgmr.msra.gmra.mxu0 %v1199_v23  ;;  %1275 = vmatmul.mubr.bf16.vlgmr.msra.gmra.mxu1 %v1199_v23  ;;  %v1822_v23 = vld [vmem:[#allocation8 + $0x8] sm:$0xff]  }
 0x6cf   :  { %1332 = vmatpush1.bf16.msra.mxu0 %v2608_v25  ;;  %1373 = vmatpush1.bf16.msra.mxu1 %v1976_v59  ;;  %v1982_v25 = vld [vmem:[#allocation6 + $0x88] ss:$16 sps:$4 sm:$0xff]   ;;  %v1823_v59 = vld [vmem:[#allocation8] sm:$0xff]  }
 0x6d0   :  { %1333 = vmatprep.subr.bf16.mxu0 %v2612_v52  ;;  %1374 = vmatprep.subr.bf16.mxu1 %v1977_v15  ;;  %v1984_v52 = vld [vmem:[#allocation6 + $0x68] ss:$16 sps:$4 sm:$0xff]  }
 0x6d1   :  { %1363 = vmatprep.mubr.bf16.mxu0 %v2170_v0  ;;  %1404 = vmatprep.mubr.bf16.mxu1 %v2170_v0  ;;  %v1983_v0 = vld [vmem:[#allocation6 + $0x6c] ss:$16 sps:$4 sm:$0xff]  }
 0x6d3   :  { %1334 = vmatpush1.bf16.msra.mxu0 %v2618_v28  ;;  %1375 = vmatpush1.bf16.msra.mxu1 %v1978_v27  ;;  %v1985_v28 = vld [vmem:[#allocation6 + $0x4c] ss:$16 sps:$4 sm:$0xff]  }
 0x6d4   :  { %1335 = vmatprep.subr.bf16.mxu0 %v2622_v33  ;;  %1376 = vmatprep.subr.bf16.mxu1 %v1979_v14  ;;  %v1986_v33 = vld [vmem:[#allocation6 + $0x48] ss:$16 sps:$4 sm:$0xff]  }
 0x6d7   :  { %1336 = vmatpush1.bf16.msra.mxu0 %v2626_v36  ;;  %1377 = vmatpush1.bf16.msra.mxu1 %v1980_v26  ;;  %v1987_v36 = vld [vmem:[#allocation6 + $0x2c] ss:$16 sps:$4 sm:$0xff]  }
 0x6d8   :  { %1337 = vmatprep.subr.bf16.mxu0 %v2630_v37  ;;  %1378 = vmatprep.subr.bf16.mxu1 %v1981_v32  ;;  %v1988_v37 = vld [vmem:[#allocation6 + $0x28] ss:$16 sps:$4 sm:$0xff]  }
 0x6db   :  { %1338 = vmatpush1.bf16.msra.mxu0 %v2634_v60  ;;  %1379 = vmatpush1.bf16.msra.mxu1 %v1982_v25  ;;  %v1989_v60 = vld [vmem:[#allocation6 + $0xc] ss:$16 sps:$4 sm:$0xff]  }
 0x6dc   :  { %1339 = vmatprep.subr.bf16.mxu0 %v2638_v38  ;;  %1380 = vmatprep.subr.bf16.mxu1 %v1983_v0  ;;  %v1990_v38 = vld [vmem:[#allocation6 + $0x8] ss:$16 sps:$4 sm:$0xff]  }
 0x6df   :  { %1340 = vmatpush1.bf16.msra.mxu0 %v2642_v39  ;;  %1381 = vmatpush1.bf16.msra.mxu1 %v1984_v52 }
 0x6e0   :  { %1341 = vmatprep.subr.bf16.mxu0 %v2646_v40  ;;  %1382 = vmatprep.subr.bf16.mxu1 %v1985_v28 }
 0x6e3   :  { %1342 = vmatpush1.bf16.msra.mxu0 %v2650_v41  ;;  %1383 = vmatpush1.bf16.msra.mxu1 %v1986_v33 }
 0x6e4   :  { %1343 = vmatprep.subr.bf16.mxu0 %v2654_v42  ;;  %1384 = vmatprep.subr.bf16.mxu1 %v1987_v36 }
 0x6e7   :  { %1344 = vmatpush1.bf16.msra.mxu0 %v2658_v43  ;;  %1385 = vmatpush1.bf16.msra.mxu1 %v1988_v37 }
 0x6e8   :  { %1345 = vmatprep.subr.bf16.mxu0 %v2662_v44  ;;  %1386 = vmatprep.subr.bf16.mxu1 %v1989_v60 }
 0x6eb   :  { %1346 = vmatpush1.bf16.msra.mxu0 %v2666_v45  ;;  %1387 = vmatpush1.bf16.msra.mxu1 %v1990_v38 }
 0x6ec   :  { %1724 = vmatprep.subr.bf16.mxu0 %v2171_v30 }
 0x78e   :  { %v1235_v39 = vpop.f32.mrf.mxu0  ;;  %v1276_v40 = vpop.f32.mrf.mxu1 }
 0x78f   :  { %v1287_v41 = vrot.slane %v1235_v39, 4  ;;  %v1289_v6 = vrot.slane %v1276_v40, 4 }
 0x790   :  { %v1237_v42 = vpop.f32.mrf.mxu0  ;;  %v1278_v46 = vpop.f32.mrf.mxu1 }
 0x791   :  { %v1295_v47 = vadd.f32 %v1287_v41, %v2415_v1  ;;  %v1288_v43 = vrot.slane %v1237_v42, 4  ;;  %v1290_v5 = vrot.slane %v1278_v46, 4  ;;  %v1297_v9 = vadd.f32 %v1289_v6, %v2424_v31  ;;  %v1457_v6 = vld [vmem:[#allocation2] sm:$0xff] }
 0x792   :  { %v1239_v53 = vpop.f32.mrf.mxu0  ;;  %v1280_v48 = vpop.f32.mrf.mxu1 }
 0x793   :  { %v1700_v54 = vmul.f32 -1.442695, %v1295_v47  ;;  %v1296_v44 = vadd.f32 %v1288_v43, %v2417_v10  ;;  %v1298_v49 = vadd.f32 %v1290_v5, %v2427_v34 }
 0x794   :  { %v1240_v56 = vpop.f32.mrf.mxu0  ;;  %v1281_v58 = vpop.f32.mrf.mxu1 }
 0x795   :  { %1920 = vpow2.f32 %v1700_v54  ;;  %v1701_v45 = vmul.f32 -1.442695, %v1296_v44  ;;  %v1702_v7 = vmul.f32 -1.442695, %v1298_v49 }
 0x797   :  { %1922 = vpow2.f32 %v1701_v45 }
 0x798   :  { %1924 = vpow2.f32 %v1702_v7 }
 0x7a2   :  { %v1921_v8 = vpop.eup %1920 }
 0x7a3   :  { %v1302_v50 = vadd.f32 1.0, %v1921_v8 }
 0x7a4   :  { %v1923_v4 = vpop.eup %1922 }
 0x7a5   :  { %1926 = vrcp.f32 %v1302_v50  ;;  %v1308_v35 = vadd.f32 1.0, %v1923_v4  ;;  %v1925_v12 = vpop.eup %1924 }
 0x7a6   :  { %1928 = vtanh.f32 %v1297_v9  ;;  %v1315_v19 = vadd.f32 1.0, %v1925_v12  ;;  %v1706_v9 = vld [vmem:[%s2736_s5] ss:$0 sm:$0xff]  ;;  %s2173_s5 = smov [#allocation13]  }
 0x7a7   :  { %1930 = vrcp.f32 %v1308_v35  ;;  %s1612_s28 = sshll.u32 %s2173_s5, 4  ;;  %s1613_s28 = int_to_ptr.vmem [resolvable:$true] %s1612_s28 }
 0x7a8   :  { %1932 = vrcp.f32 %v1315_v19  ;;  %s2091_s29 = scalar_lea.vmem %s1613_s28, 32  ;;  %p2096_p12 = scmp.lt.s32.totalorder %s1613_s28, %s1613_s28 }
 0x7a9   :  { %p2092_p11 = scmp.ne.s32.totalorder %s1613_s28, %s2091_s29  ;;  %p2097_p13 = scmp.lt.s32.totalorder %s2091_s29, %s2091_s29 }
 0x7ab   :  { %p2098_p0 = por %p2097_p13, %p2096_p12 }
 0x7ad   :  { %p2099_p1 = pnand %p2098_p0, %p2092_p11 }
 0x7b2   :  { %v1927_v13 = vpop.eup %1926 }
 0x7b3   :  { %v1929_v16 = vpop.eup %1928 }
 0x7b4   :  { %v1931_v18 = vpop.eup %1930  ;;  %v1322_v20 = vmul.f32 %v1929_v16, %v1927_v13 }
 0x7b5   :  { %v1321_v21 = vmul.f32 %v1931_v18, %v1319_v17  ;;  %v1933_v63 = vpop.eup %1932 }
 0x7b7   :  { %v2703_v22 = vadd.f32 %v1322_v20, %v1321_v21 }
 0x7b9   :  { %1934 = vtanh.f32 %v2703_v22  ;;  %v1449_v54 = vrot.slane %v2703_v22, 6 }
 0x7c6   :  { %v1935_v61 = vpop.eup %1934 }
 0x7c7   :  { %v1325_v55 = vmul.f32 %v1935_v61, %v1933_v63 }
 0x7c9   :  { %1326 = vst [vmem:[#allocation2 + $0x8] sm:$0x30] %v1325_v55  ;;  %v1327_v57 = vpack.c.bf16 %v1325_v55, %v1325_v55 }
 0x7cb   :  { %v1329_v3 = vrot.slane %v1327_v57, 2 }
 0x7cd   :  { %1364 = vmatmul.mubr.bf16.vlgmr.msra.gmra.mxu0 %v1329_v3  ;;  %1405 = vmatmul.mubr.bf16.vlgmr.msra.gmra.mxu1 %v1329_v3 }
 0x7ce   :  { %1725 = vmatpush3.bf16.msra.mxu0 %v1816_v62  ;;  %1740 = vmatprep.mubr.msk.bf16.mxu0 %vm2172_vm4, %v2171_v30 }
 0x7cf   :  { %1726 = vmatprep.subr.bf16.mxu0 %v2171_v30 }
 0x7d2   :  { %1727 = vmatpush3.bf16.msra.mxu0 %v1817_v29 }
 0x7d3   :  { %1728 = vmatprep.subr.bf16.mxu0 %v2171_v30 }
 0x7d6   :  { %1729 = vmatpush3.bf16.msra.mxu0 %v1818_v2 }
 0x7d7   :  { %1730 = vmatprep.subr.bf16.mxu0 %v2171_v30 }
 0x7da   :  { %1731 = vmatpush3.bf16.msra.mxu0 %v1819_v51 }
 0x7db   :  { %1732 = vmatprep.subr.bf16.mxu0 %v2171_v30 }
 0x7de   :  { %1733 = vmatpush3.bf16.msra.mxu0 %v1820_v11 }
 0x7df   :  { %1734 = vmatprep.subr.bf16.mxu0 %v2171_v30 }
 0x7e2   :  { %1735 = vmatpush3.bf16.msra.mxu0 %v1821_v24 }
 0x7e3   :  { %1736 = vmatprep.subr.bf16.mxu0 %v2171_v30 }
 0x7e6   :  { %1737 = vmatpush3.bf16.msra.mxu0 %v1822_v23 }
 0x7e7   :  { %1738 = vmatprep.subr.bf16.mxu0 %v2171_v30 }
 0x7ea   :  { %1739 = vmatpush3.bf16.msra.mxu0 %v1823_v59 }
 0x88d   :  { %v1365_v15 = vpop.f32.mrf.mxu0  ;;  %v1406_v27 = vpop.f32.mrf.mxu1 }
 0x88e   :  { %v1417_v14 = vrot.slane %v1365_v15, 2  ;;  %v1419_v40 = vrot.slane %v1406_v27, 2 }
 0x88f   :  { %v1367_v26 = vpop.f32.mrf.mxu0  ;;  %v1408_v32 = vpop.f32.mrf.mxu1 }
 0x890   :  { %v1425_v25 = vadd.f32 %v1417_v14, %v2415_v1  ;;  %v1418_v0 = vrot.slane %v1367_v26, 2  ;;  %v1420_v30 = vrot.slane %v1408_v32, 2  ;;  %v1427_v46 = vadd.f32 %v1419_v40, %v2424_v31 }
 0x891   :  { %v1369_v52 = vpop.f32.mrf.mxu0  ;;  %v1410_v28 = vpop.f32.mrf.mxu1 }
 0x892   :  { %v1703_v33 = vmul.f32 -1.442695, %v1425_v25  ;;  %v1426_v36 = vadd.f32 %v1418_v0, %v2417_v10  ;;  %v1428_v39 = vadd.f32 %v1420_v30, %v2427_v34 }
 0x893   :  { %v1370_v37 = vpop.f32.mrf.mxu0  ;;  %v1411_v60 = vpop.f32.mrf.mxu1 }
 0x894   :  { %1936 = vpow2.f32 %v1703_v33  ;;  %v1704_v38 = vmul.f32 -1.442695, %v1426_v36  ;;  %v1705_v41 = vmul.f32 -1.442695, %v1428_v39 }
 0x896   :  { %1938 = vpow2.f32 %v1704_v38 }
 0x897   :  { %1940 = vpow2.f32 %v1705_v41 }
 0x8a1   :  { %v1937_v42 = vpop.eup %1936 }
 0x8a2   :  { %v1432_v1 = vadd.f32 1.0, %v1937_v42 }
 0x8a3   :  { %v1939_v47 = vpop.eup %1938 }
 0x8a4   :  { %1942 = vrcp.f32 %v1432_v1  ;;  %v1438_v43 = vadd.f32 1.0, %v1939_v47  ;;  %v1941_v10 = vpop.eup %1940 }
 0x8a5   :  { %1944 = vtanh.f32 %v1427_v46  ;;  %v1445_v56 = vadd.f32 1.0, %v1941_v10 }
 0x8a6   :  { %1946 = vrcp.f32 %v1438_v43 }
 0x8a7   :  { %1948 = vrcp.f32 %v1445_v56 }
 0x8b1   :  { %v1943_v53 = vpop.eup %1942 }
 0x8b2   :  { %v1945_v48 = vpop.eup %1944 }
 0x8b3   :  { %v1947_v44 = vpop.eup %1946  ;;  %v1452_v34 = vmul.f32 %v1945_v48, %v1943_v53 }
 0x8b4   :  { %v1451_v58 = vmul.f32 %v1947_v44, %v1449_v54  ;;  %v1949_v31 = vpop.eup %1948 }
 0x8b6   :  { %v1453_v45 = vadd.f32 %v1452_v34, %v1451_v58 }
 0x8b8   :  { %1950 = vtanh.f32 %v1453_v45  ;;  %1593 = vst [vmem:[#allocation15 - $0x6] sm:$0xc0] %v1453_v45 }
 0x8c5   :  { %v1951_v5 = vpop.eup %1950 }
 0x8c6   :  { %v1455_v49 = vmul.f32 %v1951_v5, %v1949_v31 }
 0x8c8   :  { %1456 = vst [vmem:[#allocation2 + $0x8] sm:$0xc0] %v1455_v49  ;;  %1592 = vst [vmem:[#allocation13 - $0x6] sm:$0xc0] %v1455_v49 }
 0x8cf   :  { %v1458_v7 = vld [vmem:[#allocation2 + $0x8] sm:$0xff] }
 0x8d0   :  { %v1459_v8 = vpack.c.bf16 %v1458_v7, %v1457_v6 }
 0x8d2   :  { %1741 = vmatmul.mubr.bf16.vlgmr.msra.gmra.mxu0 %v1459_v8 }
 0x992   :  { %v1565_v50 = vpop.f32.mrf.mxu0 }
 0x993   :  { %v1566_v4 = vadd.f32 %v1706_v9, %v1565_v50 }
 0x994   :  { %v1742_v35 = vpop.f32.mrf.mxu0 }
 0x995   :  { %1572 = vmax.xlane.f32.xlu1 %v1566_v4 }
 0x996   :  { %v1568_v12 = vpop.f32.mrf.mxu0 }
 0x997   :  { %v1569_v13 = vadd.f32 %v1706_v9, %v1568_v12 }
 0x998   :  { %v1743_v16 = vpop.f32.mrf.mxu0 }
 0x999   :  { %1574 = vmax.xlane.f32.xlu1 %v1569_v13 }
 0xa1e   :  { %v1573_v17 = vpop.xlane.xlu1 %1572 }
 0xa1f   :  { %v1576_v18 = vsub.f32 %v1566_v4, %v1573_v17 }
 0xa21   :  { %v1578_v19 = vmul.f32 1.442695, %v1576_v18 }
 0xa22   :  { %v1575_v20 = vpop.xlane.xlu1 %1574 }
 0xa23   :  { %1952 = vpow2.f32 %v1578_v19  ;;  %v1577_v21 = vsub.f32 %v1569_v13, %v1575_v20 }
 0xa25   :  { %v1580_v22 = vmul.f32 1.442695, %v1577_v21 }
 0xa27   :  { %1954 = vpow2.f32 %v1580_v22 }
 0xa30   :  { %v1953_v63 = vpop.eup %1952 }
 0xa31   :  { %1582 = vadd.xlane.f32.xlu0 %v1953_v63 }
 0xa34   :  { %v1955_v61 = vpop.eup %1954 }
 0xa35   :  { %1584 = vadd.xlane.f32.xlu1 %v1955_v61 }
 0xa36   :  { %2102 = shalt.err (!%p2099_p1)
}
 0xa37   :  { %1615 = dma.vmem_to_hbm [thread:$0]  %s1613_s28, 32, %s2740_s9, [#allocation14]  }
 0xa38   :  { %s2174_s6 = smov [#allocation15]  }
 0xa39   :  { %s1622_s12 = sshll.u32 %s2174_s6, 4  ;;  %s1623_s12 = int_to_ptr.vmem [resolvable:$true] %s1622_s12 }
 0xa3a   :  { %s2111_s13 = scalar_lea.vmem %s1623_s12, 32  ;;  %p2116_p3 = scmp.lt.s32.totalorder %s1623_s12, %s1623_s12 }
 0xa3b   :  { %p2112_p2 = scmp.ne.s32.totalorder %s1623_s12, %s2111_s13  ;;  %p2117_p4 = scmp.lt.s32.totalorder %s2111_s13, %s2111_s13 }
 0xa3d   :  { %p2118_p5 = por %p2117_p4, %p2116_p3 }
 0xa3f   :  { %p2119_p6 = pnand %p2118_p5, %p2112_p2 }
 0xa41   :  { %2122 = shalt.err (!%p2119_p6)
}
 0xa42   :  { %1625 = dma.vmem_to_hbm [thread:$0]  %s1623_s12, 32, %s2741_s10, [#allocation14]  }
 0xa43   :  { %s2175_s9 = smov [#allocation12]  }
 0xa44   :  { %s1599_s16 = sshll.u32 %s2175_s9, 4  ;;  %s1600_s16 = int_to_ptr.vmem [resolvable:$true] %s1599_s16 }
 0xa45   :  { %s2131_s2 = scalar_lea.vmem %s1600_s16, 256  ;;  %p2136_p8 = scmp.lt.s32.totalorder %s1600_s16, %s1600_s16 }
 0xa46   :  { %p2132_p7 = scmp.ne.s32.totalorder %s1600_s16, %s2131_s2  ;;  %p2137_p9 = scmp.lt.s32.totalorder %s2131_s2, %s2131_s2 }
 0xa48   :  { %p2138_p10 = por %p2137_p9, %p2136_p8 }
 0xa4a   :  { %p2139_p11 = pnand %p2138_p10, %p2132_p7 }
 0xaba   :  { %v1583_v55 = vpop.xlane.xlu0 %1582 }
 0xabb   :  { %1956 = vrcp.f32 %v1583_v55 }
 0xabe   :  { %v1585_v57 = vpop.xlane.xlu1 %1584 }
 0xabf   :  { %1958 = vrcp.f32 %v1585_v57 }
 0xac8   :  { %v1957_v3 = vpop.eup %1956 }
 0xac9   :  { %v1587_v62 = vmul.f32 %v1957_v3, %v1953_v63 }
 0xacb   :  { %1590 = vst [vmem:[#allocation12] sm:$0xff] %v1587_v62 }
 0xacc   :  { %v1959_v29 = vpop.eup %1958 }
 0xacd   :  { %v1589_v2 = vmul.f32 %v1959_v29, %v1955_v61 }
 0xacf   :  { %1591 = vst [vmem:[#allocation12 + $0x8] sm:$0xff] %v1589_v2 }
 0xad0   :  { %2142 = shalt.err (!%p2139_p11)
}
 0xad1   :  { %s2176_s10 = smov 128   ;;  %s2177_s17 = smov 8  }
 0xad2   :  { %1605 = dma.vmem_to_hbm [thread:$0]  %s1600_s16, 256, %s2739_s8, [#allocation5], %s2176_s10, %s2176_s10, %s2177_s17  }
 0xad3   :  { %2157 = dma.done.wait [#allocation5], 256  }
 0xad4   :  { %2158 = vsyncadd [#allocation5], 4294967040 }
 0xad5   :  { %2159 = dma.done.wait [#allocation14], 64  }
 0xad6   :  { %2160 = vsyncadd [#allocation14], 4294967232 }
 0xad7   :  { %1635 = vsyncpa [#allocation4], 1 }
 0xad8   :  { %1636 = vsyncpa [#allocation7], 1 }
 0xad9   :  { %1637 = vsyncpa [#allocation10], 1 }
 0xada   :  { %1638 = vsyncpa [#allocation5], 1 }
 0xadb   :  { %1639 = vsyncpa [#allocation14], 1 }

</bundles_post_ra>
